<compile_context>
chip_gen: v7x
topology: tpu7x:2x2x1
jax: 0.10.0
libtpu: 0.0.40
codegen_flags: <defaults>
</compile_context>

<pallas_src>
import jax
import jax.numpy as jnp
import numpy as np
from jax.experimental import pallas as pl
from jax.experimental.pallas import tpu as pltpu

LANE = 128


def _round_up(x, m):
    return ((x + m - 1) // m) * m


def _pad2(x, rows, cols, dtype=jnp.float32):
    r, c = x.shape
    return jnp.pad(x.astype(jnp.float32), ((0, rows - r), (0, cols - c))).astype(dtype)


def gtc_kernel(obj_ref, pred_ref, ecols_ref, erow_ref,
               w1so_ref, w1p_ref, w1b_ref, w2a_ref, w2b_ref, bias_ref,
               new_obj_ref, new_pred_ref,
               proj_stack, msg_stack):
    f32 = jnp.float32
    bf16 = jnp.bfloat16

    N_p = obj_ref.shape[0]
    T_p = pred_ref.shape[0]
    H_p = proj_stack.shape[1]
    Dpo_p = new_pred_ref.shape[1]
    Dout_p = new_obj_ref.shape[1]

    # ---- packed biases (one operand, lane-aligned static slices) -------------------
    bias = bias_ref[...]                               # (4, Wb) f32
    b1a = bias[0:1, 0:H_p]
    b1b = bias[1:2, 0:2 * H_p + Dpo_p]
    b2a = bias[2:3, 0:H_p]
    b2b = bias[3:4, 0:Dout_p]

    # ---- net1 layer 1: fused [W_s | W_o] projection of the object table (bf16 MXU) --
    proj_so = jnp.dot(obj_ref[...], w1so_ref[...],
                      preferred_element_type=f32)      # (N_p, 2*H_p)
    proj_stack[pl.ds(0, N_p), :] = proj_so[:, 0:H_p]          # subject projections
    proj_stack[pl.ds(N_p, N_p), :] = proj_so[:, H_p:2 * H_p]  # object projections
    proj_p = jnp.dot(pred_ref[...], w1p_ref[...],
                     preferred_element_type=f32)       # (T_p, H_p)

    # Fused gather one-hot (T_p, 2*N_p): lanes [0,N_p) pick subject, [N_p,2*N_p) object.
    # Padding triples carry index -1 and never match (their one-hot row is all zero).
    ecols = ecols_ref[...]                             # (T_p, 2) int32
    s_col = ecols[:, 0:1]
    o_col = ecols[:, 1:2]
    lane2n = jax.lax.broadcasted_iota(jnp.int32, (T_p, 2 * N_p), 1)
    tgt = jnp.where(lane2n < N_p, s_col, o_col + N_p)
    gh = (lane2n == tgt).astype(f32)

    # Exact gather (f32 one-hot x f32 table) — single matmul, 2*N_p-deep contraction.
    gath = jnp.dot(gh, proj_stack[...], preferred_element_type=f32)   # (T_p, H_p)
    h1 = jnp.maximum(gath + proj_p + b1a, 0.0)

    # ---- net1 layer 2: one fused matmul over [s | p | o] 128-lane column blocks -----
    t_out = jnp.dot(h1.astype(bf16), w1b_ref[...],
                    preferred_element_type=f32) + b1b               # (T_p, 2*H_p+Dpo_p)
    t_out = jnp.maximum(t_out, 0.0)    # net1 final nonlinearity (use_net2=True)
    new_s = t_out[:, 0:H_p]
    new_p = t_out[:, H_p:H_p + Dpo_p]
    new_o = t_out[:, H_p + Dpo_p:2 * H_p + Dpo_p]
    msg_stack[pl.ds(0, T_p), :] = new_s
    msg_stack[pl.ds(T_p, T_p), :] = new_o

    # ---- scatter-add pooling: fused incidence (N_p, 2*T_p) @ stacked messages -------
    sub_n = jax.lax.broadcasted_iota(jnp.int32, (N_p, 2 * T_p), 0)
    inc = (sub_n == erow_ref[...]).astype(f32)
    pooled = jnp.dot(inc, msg_stack[...], preferred_element_type=f32)   # (N_p, H_p)

    # 'avg' pooling: degree counts from a single XLU lane-reduce of the fused incidence.
    counts = jnp.maximum(jnp.sum(inc, axis=1, keepdims=True), 1.0)       # (N_p, 1)
    pooled = pooled * pl.reciprocal(counts, approx=False)

    # ---- net2: Linear -> ReLU -> Linear, final ReLU on object outputs ---------------
    h2 = jnp.maximum(jnp.dot(pooled.astype(bf16), w2a_ref[...],
                             preferred_element_type=f32) + b2a, 0.0)
    out_obj = jnp.dot(h2.astype(bf16), w2b_ref[...],
                      preferred_element_type=f32) + b2b

    new_obj_ref[...] = jnp.maximum(out_obj, 0.0)   # final_nonlinearity=True
    new_pred_ref[...] = new_p                      # predicates only get net1's ReLU


def graph_triple_conv(obj_vecs, pred_vecs, edges, params, *, H, Dout, Dout_pred):
    N, Din_obj = obj_vecs.shape
    T, Din_pred = pred_vecs.shape
    (w1a, b1a, w1b, b1b, w2a, b2a, w2b, b2b) = params

    # Pad row counts and all feature dims to the full 128-lane width so the one-hot /
    # incidence matmuls are lane-dense with full-depth contractions.  Zero pad is exact.
    N_p = _round_up(N, LANE)
    T_p = _round_up(T, LANE)
    Dobj_p = _round_up(Din_obj, LANE)
    Dpred_p = _round_up(Din_pred, LANE)
    H_p = _round_up(H, LANE)
    Dout_p = _round_up(Dout, LANE)
    Dpo_p = _round_up(Dout_pred, LANE)

    # Activations in bf16 (dense MXU layers consume them; halves their DMA too).
    obj_p = _pad2(obj_vecs, N_p, Dobj_p, jnp.bfloat16)
    pred_p = _pad2(pred_vecs, T_p, Dpred_p, jnp.bfloat16)

    # Edge indices, padding triples marked -1 (never matches a real object row).
    s_idx = edges[:, 0].astype(jnp.int32)
    o_idx = edges[:, 1].astype(jnp.int32)
    s_pad = jnp.pad(s_idx, (0, T_p - T), constant_values=-1)
    o_pad = jnp.pad(o_idx, (0, T_p - T), constant_values=-1)
    ecols = jnp.stack([s_pad, o_pad], axis=1)                       # (T_p, 2)
    erow = jnp.concatenate([s_pad, o_pad]).reshape(1, 2 * T_p)      # (1, 2*T_p)

    # net1 layer 1: fused [W_s | W_o] for the object table + separate W_p (bf16).
    w1s = _pad2(w1a[:Din_obj, :], Dobj_p, H_p)
    w1o = _pad2(w1a[Din_obj + Din_pred:, :], Dobj_p, H_p)
    w1so = jnp.concatenate([w1s, w1o], axis=1).astype(jnp.bfloat16)         # (Dobj_p, 2*H_p)
    w1p = _pad2(w1a[Din_obj:Din_obj + Din_pred, :], Dpred_p, H_p, jnp.bfloat16)

    # net1 layer 2: one fused weight with 128-lane-aligned [s | p | o] column blocks.
    w1bs = _pad2(w1b[:, :H], H_p, H_p)
    w1bp = _pad2(w1b[:, H:H + Dout_pred], H_p, Dpo_p)
    w1bo = _pad2(w1b[:, H + Dout_pred:2 * H + Dout_pred], H_p, H_p)
    w1bf = jnp.concatenate([w1bs, w1bp, w1bo], axis=1).astype(jnp.bfloat16)  # (H_p, 2*H_p+Dpo_p)

    # net2 weights (bf16).
    w2a_p = _pad2(w2a, H_p, H_p, jnp.bfloat16)
    w2b_p = _pad2(w2b, H_p, Dout_p, jnp.bfloat16)

    # Pack all biases into a single f32 operand (cuts per-operand DMA/setup cost).
    Wb = max(2 * H_p + Dpo_p, H_p, Dout_p)
    b1b_fused = jnp.concatenate(
        [_pad2(b1b[:, :H], 1, H_p),
         _pad2(b1b[:, H:H + Dout_pred], 1, Dpo_p),
         _pad2(b1b[:, H + Dout_pred:2 * H + Dout_pred], 1, H_p)], axis=1)
    biases = jnp.concatenate(
        [_pad2(b1a, 1, Wb), _pad2(b1b_fused, 1, Wb),
         _pad2(b2a, 1, Wb), _pad2(b2b, 1, Wb)], axis=0)              # (4, Wb)

    inputs = (obj_p, pred_p, ecols, erow, w1so, w1p, w1bf, w2a_p, w2b_p, biases)

    # vmem limit from the actual resident set (inputs + outputs + scratch), with slack
    # for in-kernel temporaries; capped below v7x's 64 MiB physical VMEM.
    resident = sum(int(np.prod(a.shape)) * a.dtype.itemsize for a in inputs)
    resident += (N_p * Dout_p + T_p * Dpo_p) * 4                      # outputs
    resident += (2 * N_p * H_p + 2 * T_p * H_p) * 4                   # stacked scratches
    vmem_limit = int(min(60 * 1024 * 1024, max(16 * 1024 * 1024, 4 * resident)))

    vmem = pl.BlockSpec(memory_space=pltpu.MemorySpace.VMEM)
    new_obj_p, new_pred_p = pl.pallas_call(
        gtc_kernel,
        out_shape=(jax.ShapeDtypeStruct((N_p, Dout_p), jnp.float32),
                   jax.ShapeDtypeStruct((T_p, Dpo_p), jnp.float32)),
        in_specs=[vmem] * len(inputs),
        out_specs=(vmem, vmem),
        scratch_shapes=[pltpu.VMEM((2 * N_p, H_p), jnp.float32),   # stacked s/o projections
                        pltpu.VMEM((2 * T_p, H_p), jnp.float32)],  # stacked s/o messages
        compiler_params=pltpu.CompilerParams(vmem_limit_bytes=vmem_limit),
    )(*inputs)

    # Slice padding back off outside the kernel (stores inside stay lane-dense).
    return new_obj_p[:N, :Dout], new_pred_p[:T, :Dout_pred]


def reference(obj_vecs, pred_vecs, edges, params, *, H, Dout, Dout_pred):
    """Pure-JAX f32 reference mirroring the PyTorch forward."""
    (w1a, b1a, w1b, b1b, w2a, b2a, w2b, b2b) = params
    N = obj_vecs.shape[0]
    s_idx = edges[:, 0]
    o_idx = edges[:, 1]
    cur_t = jnp.concatenate([obj_vecs[s_idx], pred_vecs, obj_vecs[o_idx]], axis=1)
    h1 = jax.nn.relu(cur_t @ w1a + b1a)
    new_t = jax.nn.relu(h1 @ w1b + b1b)
    new_s = new_t[:, :H]
    new_p = new_t[:, H:H + Dout_pred]
    new_o = new_t[:, H + Dout_pred:2 * H + Dout_pred]
    pooled = jnp.zeros((N, H), jnp.float32).at[s_idx].add(new_s).at[o_idx].add(new_o)
    counts = jnp.zeros((N,), jnp.float32).at[s_idx].add(1.0).at[o_idx].add(1.0)
    counts = jnp.maximum(counts, 1.0)
    pooled = pooled / counts[:, None]
    h2 = jax.nn.relu(pooled @ w2a + b2a)
    new_obj = jax.nn.relu(h2 @ w2b + b2b)
    return new_obj, new_p


def kaiming_linear(key, fan_in, fan_out):
    # kaiming_normal_ (fan_in mode) -> std = sqrt(2 / fan_in).  Stored as (in, out).
    kw, kb = jax.random.split(key)
    w = jax.random.normal(kw, (fan_in, fan_out), jnp.float32) * jnp.sqrt(2.0 / fan_in)
    b = jax.random.normal(kb, (1, fan_out), jnp.float32) * 0.01
    return w, b


if __name__ == "__main__":
    # Module hyper-params (defaults: output_dim = input_dim_obj, output_dim_pred = input_dim_pred)
    Din_obj, Din_pred, Hdim = 32, 32, 64
    Dout, Dout_pred = Din_obj, Din_pred
    num_objs, num_triples = 8, 16

    key = jax.random.PRNGKey(0)
    k_obj, k_pred, k_edge, k1, k2, k3, k4 = jax.random.split(key, 7)

    obj_vecs = jax.random.normal(k_obj, (num_objs, Din_obj), jnp.float32)
    pred_vecs = jax.random.normal(k_pred, (num_triples, Din_pred), jnp.float32)
    edges = jax.random.randint(k_edge, (num_triples, 2), 0, num_objs, jnp.int32)

    # net1: [2*Din_obj + Din_pred, H, 2*H + Dout_pred]; net2: [H, H, Dout]
    w1a, b1a = kaiming_linear(k1, 2 * Din_obj + Din_pred, Hdim)
    w1b, b1b = kaiming_linear(k2, Hdim, 2 * Hdim + Dout_pred)
    w2a, b2a = kaiming_linear(k3, Hdim, Hdim)
    w2b, b2b = kaiming_linear(k4, Hdim, Dout)
    params = (w1a, b1a, w1b, b1b, w2a, b2a, w2b, b2b)

    new_obj, new_pred = graph_triple_conv(
        obj_vecs, pred_vecs, edges, params, H=Hdim, Dout=Dout, Dout_pred=Dout_pred)
    jax.block_until_ready((new_obj, new_pred))

    ref_obj, ref_pred = reference(
        obj_vecs, pred_vecs, edges, params, H=Hdim, Dout=Dout, Dout_pred=Dout_pred)

    # Gather/scatter/pooling wiring is exact; the relaxed tolerance only absorbs the
    # bf16 rounding of the dense weight matmuls vs the f32 reference.
    np.testing.assert_allclose(np.asarray(new_obj), np.asarray(ref_obj), rtol=5e-2, atol=5e-2)
    np.testing.assert_allclose(np.asarray(new_pred), np.asarray(ref_pred), rtol=5e-2, atol=5e-2)

    print("KERNEL_OK")
</pallas_src>

<mosaic_0001>
module attributes {stable_mosaic.version = 11 : i64} {
  func.func @gtc_kernel(%arg0: memref<128x128xbf16, #tpu.memory_space<vmem>>, %arg1: memref<128x128xbf16, #tpu.memory_space<vmem>>, %arg2: memref<128x2xi32, #tpu.memory_space<vmem>>, %arg3: memref<1x256xi32, #tpu.memory_space<vmem>>, %arg4: memref<128x256xbf16, #tpu.memory_space<vmem>>, %arg5: memref<128x128xbf16, #tpu.memory_space<vmem>>, %arg6: memref<128x384xbf16, #tpu.memory_space<vmem>>, %arg7: memref<128x128xbf16, #tpu.memory_space<vmem>>, %arg8: memref<128x128xbf16, #tpu.memory_space<vmem>>, %arg9: memref<4x384xf32, #tpu.memory_space<vmem>>, %arg10: memref<128x128xf32, #tpu.memory_space<vmem>>, %arg11: memref<128x128xf32, #tpu.memory_space<vmem>>, %arg12: memref<256x128xf32, #tpu.memory_space<vmem>>, %arg13: memref<256x128xf32, #tpu.memory_space<vmem>>) attributes {dimension_semantics = [], scalar_prefetch = 0 : i64, scratch_operands = 2 : i64, tpu.core_type = #tpu.core_type<tc>} {
    %c0 = arith.constant 0 : index
    %c0_0 = arith.constant 0 : index
    %0 = vector.load %arg9[%c0, %c0_0] : memref<4x384xf32, #tpu.memory_space<vmem>>, vector<4x384xf32>
    %1 = vector.extract_strided_slice %0 {offsets = [0, 0], sizes = [1, 128], strides = [1, 1]} : vector<4x384xf32> to vector<1x128xf32>
    %2 = vector.extract_strided_slice %0 {offsets = [1, 0], sizes = [1, 384], strides = [1, 1]} : vector<4x384xf32> to vector<1x384xf32>
    %3 = vector.extract_strided_slice %0 {offsets = [2, 0], sizes = [1, 128], strides = [1, 1]} : vector<4x384xf32> to vector<1x128xf32>
    %4 = vector.extract_strided_slice %0 {offsets = [3, 0], sizes = [1, 128], strides = [1, 1]} : vector<4x384xf32> to vector<1x128xf32>
    %c0_1 = arith.constant 0 : index
    %c0_2 = arith.constant 0 : index
    %5 = vector.load %arg0[%c0_1, %c0_2] : memref<128x128xbf16, #tpu.memory_space<vmem>>, vector<128x128xbf16>
    %c0_3 = arith.constant 0 : index
    %c0_4 = arith.constant 0 : index
    %6 = vector.load %arg4[%c0_3, %c0_4] : memref<128x256xbf16, #tpu.memory_space<vmem>>, vector<128x256xbf16>
    %cst = arith.constant dense<0.000000e+00> : vector<128x256xf32>
    %7 = tpu.matmul %5, %6, %cst {dimension_numbers = #tpu.dot_dimension_numbers<[1], [0], [0], [1], [0, 0, 1, 1], [], []>} : vector<128x128xbf16>, vector<128x256xbf16>, vector<128x256xf32> -> vector<128x256xf32>
    %8 = vector.extract_strided_slice %7 {offsets = [0, 0], sizes = [128, 128], strides = [1, 1]} : vector<128x256xf32> to vector<128x128xf32>
    %c0_5 = arith.constant 0 : index
    %c0_6 = arith.constant 0 : index
    %9 = vector.load %arg12[%c0_5, %c0_6] : memref<256x128xf32, #tpu.memory_space<vmem>>, vector<128x128xf32>
    tpu.vector_store %arg12[%c0_5, %c0_6], %8 {strides = array<i32>} : memref<256x128xf32, #tpu.memory_space<vmem>>, vector<128x128xf32>,
    %10 = vector.extract_strided_slice %7 {offsets = [0, 128], sizes = [128, 128], strides = [1, 1]} : vector<128x256xf32> to vector<128x128xf32>
    %c128 = arith.constant 128 : index
    %c0_7 = arith.constant 0 : index
    %11 = vector.load %arg12[%c128, %c0_7] : memref<256x128xf32, #tpu.memory_space<vmem>>, vector<128x128xf32>
    tpu.vector_store %arg12[%c128, %c0_7], %10 {strides = array<i32>} : memref<256x128xf32, #tpu.memory_space<vmem>>, vector<128x128xf32>,
    %c0_8 = arith.constant 0 : index
    %c0_9 = arith.constant 0 : index
    %12 = vector.load %arg1[%c0_8, %c0_9] : memref<128x128xbf16, #tpu.memory_space<vmem>>, vector<128x128xbf16>
    %c0_10 = arith.constant 0 : index
    %c0_11 = arith.constant 0 : index
    %13 = vector.load %arg5[%c0_10, %c0_11] : memref<128x128xbf16, #tpu.memory_space<vmem>>, vector<128x128xbf16>
    %cst_12 = arith.constant dense<0.000000e+00> : vector<128x128xf32>
    %14 = tpu.matmul %12, %13, %cst_12 {dimension_numbers = #tpu.dot_dimension_numbers<[1], [0], [0], [1], [0, 0, 1, 1], [], []>} : vector<128x128xbf16>, vector<128x128xbf16>, vector<128x128xf32> -> vector<128x128xf32>
    %c0_13 = arith.constant 0 : index
    %c0_14 = arith.constant 0 : index
    %15 = vector.load %arg2[%c0_13, %c0_14] : memref<128x2xi32, #tpu.memory_space<vmem>>, vector<128x2xi32>
    %16 = vector.extract_strided_slice %15 {offsets = [0, 0], sizes = [128, 1], strides = [1, 1]} : vector<128x2xi32> to vector<128x1xi32>
    %17 = vector.extract_strided_slice %15 {offsets = [0, 1], sizes = [128, 1], strides = [1, 1]} : vector<128x2xi32> to vector<128x1xi32>
    %18 = tpu.iota {dimensions = array<i32: 1>} : vector<128x256xi32>
    %c128_i32 = arith.constant 128 : i32
    %19 = vector.broadcast %c128_i32 : i32 to vector<128x256xi32>
    %20 = arith.cmpi slt, %18, %19 : vector<128x256xi32>
    %c128_i32_15 = arith.constant 128 : i32
    %21 = vector.broadcast %c128_i32_15 : i32 to vector<128x1xi32>
    %22 = arith.addi %17, %21 : vector<128x1xi32>
    %23 = vector.shape_cast %16 : vector<128x1xi32> to vector<128x1xi32>
    %24 = vector.broadcast %23 : vector<128x1xi32> to vector<128x256xi32>
    %25 = vector.shape_cast %22 : vector<128x1xi32> to vector<128x1xi32>
    %26 = vector.broadcast %25 : vector<128x1xi32> to vector<128x256xi32>
    %27 = arith.select %20, %24, %26 : vector<128x256xi1>, vector<128x256xi32>
    %28 = arith.cmpi eq, %18, %27 : vector<128x256xi32>
    %29 = arith.extui %28 : vector<128x256xi1> to vector<128x256xi32>
    %30 = arith.sitofp %29 : vector<128x256xi32> to vector<128x256xf32>
    %c0_16 = arith.constant 0 : index
    %c0_17 = arith.constant 0 : index
    %31 = vector.load %arg12[%c0_16, %c0_17] : memref<256x128xf32, #tpu.memory_space<vmem>>, vector<256x128xf32>
    %cst_18 = arith.constant dense<0.000000e+00> : vector<128x128xf32>
    %32 = tpu.matmul %30, %31, %cst_18 {dimension_numbers = #tpu.dot_dimension_numbers<[1], [0], [0], [1], [0, 0, 1, 1], [], []>} : vector<128x256xf32>, vector<256x128xf32>, vector<128x128xf32> -> vector<128x128xf32>
    %33 = arith.addf %32, %14 : vector<128x128xf32>
    %34 = vector.broadcast %1 : vector<1x128xf32> to vector<128x128xf32>
    %35 = arith.addf %33, %34 : vector<128x128xf32>
    %cst_19 = arith.constant 0.000000e+00 : f32
    %36 = vector.broadcast %cst_19 : f32 to vector<128x128xf32>
    %37 = arith.maximumf %35, %36 : vector<128x128xf32>
    %38 = arith.truncf %37 : vector<128x128xf32> to vector<128x128xbf16>
    %c0_20 = arith.constant 0 : index
    %c0_21 = arith.constant 0 : index
    %39 = vector.load %arg6[%c0_20, %c0_21] : memref<128x384xbf16, #tpu.memory_space<vmem>>, vector<128x384xbf16>
    %cst_22 = arith.constant dense<0.000000e+00> : vector<128x384xf32>
    %40 = tpu.matmul %38, %39, %cst_22 {dimension_numbers = #tpu.dot_dimension_numbers<[1], [0], [0], [1], [0, 0, 1, 1], [], []>} : vector<128x128xbf16>, vector<128x384xbf16>, vector<128x384xf32> -> vector<128x384xf32>
    %41 = vector.broadcast %2 : vector<1x384xf32> to vector<128x384xf32>
    %42 = arith.addf %40, %41 : vector<128x384xf32>
    %cst_23 = arith.constant 0.000000e+00 : f32
    %43 = vector.broadcast %cst_23 : f32 to vector<128x384xf32>
    %44 = arith.maximumf %42, %43 : vector<128x384xf32>
    %45 = vector.extract_strided_slice %44 {offsets = [0, 0], sizes = [128, 128], strides = [1, 1]} : vector<128x384xf32> to vector<128x128xf32>
    %46 = vector.extract_strided_slice %44 {offsets = [0, 128], sizes = [128, 128], strides = [1, 1]} : vector<128x384xf32> to vector<128x128xf32>
    %47 = vector.extract_strided_slice %44 {offsets = [0, 256], sizes = [128, 128], strides = [1, 1]} : vector<128x384xf32> to vector<128x128xf32>
    %c0_24 = arith.constant 0 : index
    %c0_25 = arith.constant 0 : index
    %48 = vector.load %arg13[%c0_24, %c0_25] : memref<256x128xf32, #tpu.memory_space<vmem>>, vector<128x128xf32>
    tpu.vector_store %arg13[%c0_24, %c0_25], %45 {strides = array<i32>} : memref<256x128xf32, #tpu.memory_space<vmem>>, vector<128x128xf32>,
    %c128_26 = arith.constant 128 : index
    %c0_27 = arith.constant 0 : index
    %49 = vector.load %arg13[%c128_26, %c0_27] : memref<256x128xf32, #tpu.memory_space<vmem>>, vector<128x128xf32>
    tpu.vector_store %arg13[%c128_26, %c0_27], %47 {strides = array<i32>} : memref<256x128xf32, #tpu.memory_space<vmem>>, vector<128x128xf32>,
    %50 = tpu.iota {dimensions = array<i32: 0>} : vector<128x256xi32>
    %c0_28 = arith.constant 0 : index
    %c0_29 = arith.constant 0 : index
    %51 = vector.load %arg3[%c0_28, %c0_29] : memref<1x256xi32, #tpu.memory_space<vmem>>, vector<1x256xi32>
    %52 = vector.broadcast %51 : vector<1x256xi32> to vector<128x256xi32>
    %53 = arith.cmpi eq, %50, %52 : vector<128x256xi32>
    %54 = arith.extui %53 : vector<128x256xi1> to vector<128x256xi32>
    %55 = arith.sitofp %54 : vector<128x256xi32> to vector<128x256xf32>
    %c0_30 = arith.constant 0 : index
    %c0_31 = arith.constant 0 : index
    %56 = vector.load %arg13[%c0_30, %c0_31] : memref<256x128xf32, #tpu.memory_space<vmem>>, vector<256x128xf32>
    %cst_32 = arith.constant dense<0.000000e+00> : vector<128x128xf32>
    %57 = tpu.matmul %55, %56, %cst_32 {dimension_numbers = #tpu.dot_dimension_numbers<[1], [0], [0], [1], [0, 0, 1, 1], [], []>} : vector<128x256xf32>, vector<256x128xf32>, vector<128x128xf32> -> vector<128x128xf32>
    %cst_33 = arith.constant dense<0.000000e+00> : vector<128xf32>
    %58 = vector.multi_reduction <add>, %55, %cst_33 [1] : vector<128x256xf32> to vector<128xf32>
    %59 = vector.shape_cast %58 : vector<128xf32> to vector<128x1xf32>
    %cst_34 = arith.constant 1.000000e+00 : f32
    %60 = vector.broadcast %cst_34 : f32 to vector<128x1xf32>
    %61 = arith.maximumf %59, %60 : vector<128x1xf32>
    %62 = tpu.reciprocal %61 : vector<128x1xf32> -> vector<128x1xf32>
    %63 = vector.broadcast %62 : vector<128x1xf32> to vector<128x128xf32>
    %64 = arith.mulf %57, %63 : vector<128x128xf32>
    %65 = arith.truncf %64 : vector<128x128xf32> to vector<128x128xbf16>
    %c0_35 = arith.constant 0 : index
    %c0_36 = arith.constant 0 : index
    %66 = vector.load %arg7[%c0_35, %c0_36] : memref<128x128xbf16, #tpu.memory_space<vmem>>, vector<128x128xbf16>
    %cst_37 = arith.constant dense<0.000000e+00> : vector<128x128xf32>
    %67 = tpu.matmul %65, %66, %cst_37 {dimension_numbers = #tpu.dot_dimension_numbers<[1], [0], [0], [1], [0, 0, 1, 1], [], []>} : vector<128x128xbf16>, vector<128x128xbf16>, vector<128x128xf32> -> vector<128x128xf32>
    %68 = vector.broadcast %3 : vector<1x128xf32> to vector<128x128xf32>
    %69 = arith.addf %67, %68 : vector<128x128xf32>
    %cst_38 = arith.constant 0.000000e+00 : f32
    %70 = vector.broadcast %cst_38 : f32 to vector<128x128xf32>
    %71 = arith.maximumf %69, %70 : vector<128x128xf32>
    %72 = arith.truncf %71 : vector<128x128xf32> to vector<128x128xbf16>
    %c0_39 = arith.constant 0 : index
    %c0_40 = arith.constant 0 : index
    %73 = vector.load %arg8[%c0_39, %c0_40] : memref<128x128xbf16, #tpu.memory_space<vmem>>, vector<128x128xbf16>
    %cst_41 = arith.constant dense<0.000000e+00> : vector<128x128xf32>
    %74 = tpu.matmul %72, %73, %cst_41 {dimension_numbers = #tpu.dot_dimension_numbers<[1], [0], [0], [1], [0, 0, 1, 1], [], []>} : vector<128x128xbf16>, vector<128x128xbf16>, vector<128x128xf32> -> vector<128x128xf32>
    %75 = vector.broadcast %4 : vector<1x128xf32> to vector<128x128xf32>
    %76 = arith.addf %74, %75 : vector<128x128xf32>
    %cst_42 = arith.constant 0.000000e+00 : f32
    %77 = vector.broadcast %cst_42 : f32 to vector<128x128xf32>
    %78 = arith.maximumf %76, %77 : vector<128x128xf32>
    %c0_43 = arith.constant 0 : index
    %c0_44 = arith.constant 0 : index
    %79 = vector.load %arg10[%c0_43, %c0_44] : memref<128x128xf32, #tpu.memory_space<vmem>>, vector<128x128xf32>
    tpu.vector_store %arg10[%c0_43, %c0_44], %78 {strides = array<i32>} : memref<128x128xf32, #tpu.memory_space<vmem>>, vector<128x128xf32>,
    %c0_45 = arith.constant 0 : index
    %c0_46 = arith.constant 0 : index
    %80 = vector.load %arg11[%c0_45, %c0_46] : memref<128x128xf32, #tpu.memory_space<vmem>>, vector<128x128xf32>
    tpu.vector_store %arg11[%c0_45, %c0_46], %46 {strides = array<i32>} : memref<128x128xf32, #tpu.memory_space<vmem>>, vector<128x128xf32>,
    return
  }
}

</mosaic_0001>

<bundles_post_ra>
// kernel: tpu_custom_call.1
= control target key start
LH: loop header
LB: loop body
LE: loop exit
PB: predicated region body
PF: predicated region fallthrough
CT: control target
= control target key end

     0   :  { %17 = vsyncpa [#allocation5], 0  ;;  %s4351_s0 = inlined_call_operand.hbm [shape: bf16[128,128], index: 0, kind: input, shape index: {}]   ;;  %s4352_s1 = inlined_call_operand.hbm [shape: bf16[128,128], index: 1, kind: input, shape index: {}]   ;;  %s4353_s2 = inlined_call_operand.vmem [shape: s32[128,2], index: 2, kind: input, shape index: {}]   ;;  %s4354_s3 = inlined_call_operand.vmem [shape: s32[1,256], index: 3, kind: input, shape index: {}]   ;;  %s4355_s4 = inlined_call_operand.vmem [shape: bf16[128,256], index: 4, kind: input, shape index: {}]   ;;  %s4356_s5 = inlined_call_operand.hbm [shape: bf16[128,128], index: 5, kind: input, shape index: {}]   ;;  %s4357_s6 = inlined_call_operand.hbm [shape: bf16[128,384], index: 6, kind: input, shape index: {}]   ;;  %s4358_s7 = inlined_call_operand.hbm [shape: bf16[128,128], index: 7, kind: input, shape index: {}]   ;;  %s4359_s8 = inlined_call_operand.hbm [shape: bf16[128,128], index: 8, kind: input, shape index: {}]   ;;  %s4360_s9 = inlined_call_operand.vmem [shape: f32[4,384], index: 9, kind: input, shape index: {}]   ;;  %s4361_s10 = inlined_call_operand.hbm [shape: f32[128,128], index: 10, kind: output, shape index: {0}]   ;;  %s4362_s11 = inlined_call_operand.hbm [shape: f32[128,128], index: 11, kind: output, shape index: {1}]  }
   0x1   :  { %18 = vsyncpa [#allocation8], 0 }
   0x2   :  { %19 = vsyncpa [#allocation11], 0 }
   0x3   :  { %20 = vsyncpa [#allocation14], 0 }
   0x4   :  { %21 = vsyncpa [#allocation6], 0 }
   0x5   :  { %22 = vsyncpa [#allocation17], 0  ;;  %s3420_s17 = smov [#allocation7]   ;;  %s3421_s19 = smov [#allocation10]  }
   0x6   :  { %s40_s18 = sshll.u32 %s3420_s17, 4  ;;  %s70_s20 = sshll.u32 %s3421_s19, 4  ;;  %s41_s18 = int_to_ptr.vmem [resolvable:$true] %s40_s18  ;;  %s3498_s20 = int_to_ptr.vmem [resolvable:$true] %s70_s20 }
   0x7   :  { %s3232_s23 = scalar_lea.hbm %s4352_s1, 1024 }
   0x8   :  { %p3233_p0 = scmp.ne.s32.totalorder %s4352_s1, %s3232_s23  ;;  %p3236_p1 = scmp.lt.u32.totalorder %s3232_s23, %s4352_s1 }
   0xa   :  { %p3238_p2 = pnand %p3236_p1, %p3233_p0 }
   0xc   :  { %3241 = shalt.err (!%p3238_p2)
}
   0xd   :  { %s3242_s28 = scalar_lea.vmem %s41_s18, 1024  ;;  %p3247_p4 = scmp.lt.s32.totalorder %s41_s18, %s41_s18 }
   0xe   :  { %p3243_p3 = scmp.ne.s32.totalorder %s41_s18, %s3242_s28  ;;  %p3248_p5 = scmp.lt.s32.totalorder %s3242_s28, %s3242_s28 }
  0x10   :  { %p3249_p6 = por %p3248_p5, %p3247_p4 }
  0x12   :  { %p3250_p7 = pnand %p3249_p6, %p3243_p3 }
  0x14   :  { %3253 = shalt.err (!%p3250_p7)
}
  0x15   :  { %s3422_s29 = smov 64   ;;  %s3423_s30 = smov 4  }
  0x16   :  { %46 = dma.hbm_to_vmem [thread:$0]  %s4352_s1, 1024, %s41_s18, [#allocation8], %s3422_s29, %s3422_s29, %s3423_s30  }
  0x17   :  { %s3254_s16 = scalar_lea.hbm %s4357_s6, 3072 }
  0x18   :  { %p3255_p8 = scmp.ne.s32.totalorder %s4357_s6, %s3254_s16  ;;  %p3258_p9 = scmp.lt.u32.totalorder %s3254_s16, %s4357_s6 }
  0x1a   :  { %p3260_p10 = pnand %p3258_p9, %p3255_p8 }
  0x1c   :  { %3263 = shalt.err (!%p3260_p10)
}
  0x1d   :  { %s3264_s23 = scalar_lea.vmem %s3498_s20, 3072  ;;  %p3269_p12 = scmp.lt.s32.totalorder %s3498_s20, %s3498_s20 }
  0x1e   :  { %p3265_p11 = scmp.ne.s32.totalorder %s3498_s20, %s3264_s23  ;;  %p3270_p13 = scmp.lt.s32.totalorder %s3264_s23, %s3264_s23 }
  0x20   :  { %p3271_p0 = por %p3270_p13, %p3269_p12 }
  0x22   :  { %p3272_p1 = pnand %p3271_p0, %p3265_p11 }
  0x24   :  { %3275 = shalt.err (!%p3272_p1)
}
  0x25   :  { %s3424_s1 = smov 192   ;;  %s3425_s18 = smov 12  }
  0x26   :  { %76 = dma.hbm_to_vmem [thread:$0]  %s4357_s6, 3072, %s3498_s20, [#allocation11], %s3424_s1, %s3424_s1, %s3425_s18  }
  0x27   :  { %s3426_s26 = smov [#allocation4]   ;;  %s3427_s28 = smov [#allocation9]  }
  0x28   :  { %s28_s27 = sshll.u32 %s3426_s26, 4  ;;  %s58_s12 = sshll.u32 %s3427_s28, 4  ;;  %s29_s27 = int_to_ptr.vmem [resolvable:$true] %s28_s27  ;;  %s3532_s12 = int_to_ptr.vmem [resolvable:$true] %s58_s12 }
  0x29   :  { %s3276_s15 = scalar_lea.hbm %s4351_s0, 1024 }
  0x2a   :  { %p3277_p2 = scmp.ne.s32.totalorder %s4351_s0, %s3276_s15  ;;  %p3280_p3 = scmp.lt.u32.totalorder %s3276_s15, %s4351_s0 }
  0x2c   :  { %p3282_p4 = pnand %p3280_p3, %p3277_p2 }
  0x2e   :  { %3285 = shalt.err (!%p3282_p4)
}
  0x2f   :  { %s3286_s6 = scalar_lea.vmem %s29_s27, 1024  ;;  %p3291_p6 = scmp.lt.s32.totalorder %s29_s27, %s29_s27 }
  0x30   :  { %p3287_p5 = scmp.ne.s32.totalorder %s29_s27, %s3286_s6  ;;  %p3292_p7 = scmp.lt.s32.totalorder %s3286_s6, %s3286_s6 }
  0x32   :  { %p3293_p8 = por %p3292_p7, %p3291_p6 }
  0x34   :  { %p3294_p9 = pnand %p3293_p8, %p3287_p5 }
  0x36   :  { %3297 = shalt.err (!%p3294_p9)
}
  0x37   :  { %34 = dma.hbm_to_vmem [thread:$0]  %s4351_s0, 1024, %s29_s27, [#allocation5], %s3422_s29, %s3422_s29, %s3423_s30  }
  0x38   :  { %s3298_s18 = scalar_lea.hbm %s4356_s5, 1024 }
  0x39   :  { %p3299_p10 = scmp.ne.s32.totalorder %s4356_s5, %s3298_s18  ;;  %p3302_p11 = scmp.lt.u32.totalorder %s3298_s18, %s4356_s5 }
  0x3b   :  { %p3304_p12 = pnand %p3302_p11, %p3299_p10 }
  0x3d   :  { %3307 = shalt.err (!%p3304_p12)
}
  0x3e   :  { %s3308_s13 = scalar_lea.vmem %s3532_s12, 1024  ;;  %p3313_p0 = scmp.lt.s32.totalorder %s3532_s12, %s3532_s12 }
  0x3f   :  { %p3309_p13 = scmp.ne.s32.totalorder %s3532_s12, %s3308_s13  ;;  %p3314_p1 = scmp.lt.s32.totalorder %s3308_s13, %s3308_s13 }
  0x41   :  { %p3315_p2 = por %p3314_p1, %p3313_p0 }
  0x43   :  { %p3316_p3 = pnand %p3315_p2, %p3309_p13 }
  0x45   :  { %3319 = shalt.err (!%p3316_p3)
}
  0x46   :  { %64 = dma.hbm_to_vmem [thread:$0]  %s4356_s5, 1024, %s3532_s12, [#allocation8], %s3422_s29, %s3422_s29, %s3423_s30  }
  0x47   :  { %s3428_s14 = smov [#allocation12]   ;;  %s3429_s16 = smov [#allocation13]  }
  0x48   :  { %s82_s15 = sshll.u32 %s3428_s14, 4  ;;  %s94_s17 = sshll.u32 %s3429_s16, 4  ;;  %s83_s15 = int_to_ptr.vmem [resolvable:$true] %s82_s15  ;;  %s3569_s17 = int_to_ptr.vmem [resolvable:$true] %s94_s17 }
  0x49   :  { %s3320_s6 = scalar_lea.hbm %s4358_s7, 1024 }
  0x4a   :  { %p3321_p4 = scmp.ne.s32.totalorder %s4358_s7, %s3320_s6  ;;  %p3324_p5 = scmp.lt.u32.totalorder %s3320_s6, %s4358_s7 }
  0x4c   :  { %p3326_p6 = pnand %p3324_p5, %p3321_p4 }
  0x4e   :  { %3329 = shalt.err (!%p3326_p6)
}
  0x4f   :  { %s3330_s5 = scalar_lea.vmem %s83_s15, 1024  ;;  %p3335_p8 = scmp.lt.s32.totalorder %s83_s15, %s83_s15 }
  0x50   :  { %p3331_p7 = scmp.ne.s32.totalorder %s83_s15, %s3330_s5  ;;  %p3336_p9 = scmp.lt.s32.totalorder %s3330_s5, %s3330_s5 }
  0x52   :  { %p3337_p10 = por %p3336_p9, %p3335_p8 }
  0x54   :  { %p3338_p11 = pnand %p3337_p10, %p3331_p7 }
  0x56   :  { %3341 = shalt.err (!%p3338_p11)
}
  0x57   :  { %88 = dma.hbm_to_vmem [thread:$0]  %s4358_s7, 1024, %s83_s15, [#allocation11], %s3422_s29, %s3422_s29, %s3423_s30  }
  0x58   :  { %s3342_s26 = scalar_lea.hbm %s4359_s8, 1024 }
  0x59   :  { %p3343_p12 = scmp.ne.s32.totalorder %s4359_s8, %s3342_s26  ;;  %p3346_p13 = scmp.lt.u32.totalorder %s3342_s26, %s4359_s8 }
  0x5b   :  { %p3348_p0 = pnand %p3346_p13, %p3343_p12 }
  0x5d   :  { %3351 = shalt.err (!%p3348_p0)
}
  0x5e   :  { %s3352_s14 = scalar_lea.vmem %s3569_s17, 1024  ;;  %p3357_p2 = scmp.lt.s32.totalorder %s3569_s17, %s3569_s17 }
  0x5f   :  { %p3353_p1 = scmp.ne.s32.totalorder %s3569_s17, %s3352_s14  ;;  %p3358_p3 = scmp.lt.s32.totalorder %s3352_s14, %s3352_s14 }
  0x61   :  { %p3359_p4 = por %p3358_p3, %p3357_p2 }
  0x63   :  { %p3360_p5 = pnand %p3359_p4, %p3353_p1 }
  0x65   :  { %3363 = shalt.err (!%p3360_p5)
}
  0x66   :  { %100 = dma.hbm_to_vmem [thread:$0]  %s4359_s8, 1024, %s3569_s17, [#allocation14], %s3422_s29, %s3422_s29, %s3423_s30  }
  0x67   :  { %3408 = dma.done.wait [#allocation5], 1024  }
  0x68   :  { %3409 = vsyncadd [#allocation5], 4294966272 }
  0x69   :  { %3410 = dma.done.wait [#allocation8], 2048  }
  0x6a   :  { %3411 = vsyncadd [#allocation8], 4294965248 }
  0x6b   :  { %3412 = dma.done.wait [#allocation11], 4096  }
  0x6c   :  { %3413 = vsyncadd [#allocation11], 4294963200 }
  0x6d   :  { %3414 = dma.done.wait [#allocation14], 1024  }
  0x6e   :  { %3415 = vsyncadd [#allocation14], 4294966272  ;;  %v3430_v0 = vmov 0   ;;  %v3431_v1 = vmov 1   ;;  %v3103_v2 = vld [vmem:[%s4355_s4 + $0x4] ss:$8 sps:$4 sm:$0xff]  }
  0x6f   :  { %316 = vmatprep.mubr.bf16.mxu0 %v3430_v0  ;;  %3098 = vset.pattern.permute.xlu0 %v3431_v1  ;;  %v3105_v3 = vld [vmem:[%s4355_s4] ss:$8 sps:$4 sm:$0xff]   ;;  %v3106_v4 = vld [vmem:[%s4355_s4 + $0x14] ss:$8 sps:$4 sm:$0xff]   ;;  %v3108_v5 = vld [vmem:[%s4355_s4 + $0x10] ss:$8 sps:$4 sm:$0xff]  }
  0x70   :  { %3100 = vset.pattern.permute.xlu1 %v3430_v0  ;;  %284 = vmatprep.subr.bf16.mxu0 %v3103_v2  ;;  %v3109_v6 = vld [vmem:[%s4355_s4 + $0x24] ss:$8 sps:$4 sm:$0xff]   ;;  %v3111_v7 = vld [vmem:[%s4355_s4 + $0x20] ss:$8 sps:$4 sm:$0xff]   ;;  %v3112_v8 = vld [vmem:[%s4355_s4 + $0x34] ss:$8 sps:$4 sm:$0xff]  }
  0x71   :  { %285 = vmatpush1.bf16.msra.mxu0 %v3105_v3  ;;  %v3114_v9 = vld [vmem:[%s4355_s4 + $0x30] ss:$8 sps:$4 sm:$0xff]   ;;  %v3115_v10 = vld [vmem:[%s4355_s4 + $0x44] ss:$8 sps:$4 sm:$0xff]   ;;  %v3117_v11 = vld [vmem:[%s4355_s4 + $0x40] ss:$8 sps:$4 sm:$0xff]  }
  0x72   :  { %286 = vmatprep.subr.bf16.mxu0 %v3106_v4  ;;  %v3118_v12 = vld [vmem:[%s4355_s4 + $0x54] ss:$8 sps:$4 sm:$0xff]   ;;  %v654_v13 = vld [vmem:[%s4353_s2] sm:$0xff]  ;;  %v3120_v14 = vld [vmem:[%s4355_s4 + $0x50] ss:$8 sps:$4 sm:$0xff]  }
  0x73   :  { %v675_v15 = vadd.s32 128, %v654_v13  ;;  %v655_v16 = vld [vmem:[%s4353_s2 + $0x8] sm:$0xff]  ;;  %v656_v19 = vld [vmem:[%s4353_s2 + $0x10] sm:$0xff]  ;;  %v657_v23 = vld [vmem:[%s4353_s2 + $0x18] sm:$0xff] }
  0x74   :  { %v3121_v17 = vld [vmem:[%s4355_s4 + $0x64] ss:$8 sps:$4 sm:$0xff]   ;;  %695 = vperm.xlu1 %3100, %v655_v16   ;;  %v676_v18 = vadd.s32 128, %v655_v16  ;;  %v3123_v20 = vld [vmem:[%s4355_s4 + $0x60] ss:$8 sps:$4 sm:$0xff]   ;;  %v677_v22 = vadd.s32 128, %v656_v19 }
  0x75   :  { %287 = vmatpush1.bf16.msra.mxu0 %v3108_v5  ;;  %740 = vperm.xlu0 %3098, %v675_v15   ;;  %v3124_v21 = vld [vmem:[%s4355_s4 + $0x74] ss:$8 sps:$4 sm:$0xff]   ;;  %v3135_v24 = vld [vmem:[#allocation9] sm:$0xff]   ;;  %v3126_v25 = vld [vmem:[%s4355_s4 + $0x70] ss:$8 sps:$4 sm:$0xff]   ;;  %v678_v29 = vadd.s32 128, %v657_v23 }
  0x76   :  { %288 = vmatprep.subr.bf16.mxu0 %v3109_v6  ;;  %2888 = vmatprep.subr.bf16.mxu1 %v3135_v24  ;;  %v3136_v26 = vld [vmem:[#allocation9 + $0x8] sm:$0xff]   ;;  %v658_v27 = vld [vmem:[%s4353_s2 + $0x20] sm:$0xff]  ;;  %v3137_v28 = vld [vmem:[#allocation9 + $0x10] sm:$0xff]   ;;  %v3432_v15 = vmov 1.0  }
  0x77   :  { %2889 = vmatpush3.bf16.msra.mxu1 %v3135_v24  ;;  %v3127_v30 = vld [vmem:[#allocation4] sm:$0xff]   ;;  %v679_v31 = vadd.s32 128, %v658_v27  ;;  %v3138_v32 = vld [vmem:[#allocation9 + $0x18] sm:$0xff]   ;;  %v659_v33 = vld [vmem:[%s4353_s2 + $0x28] sm:$0xff] }
  0x78   :  { %3101 = vset.pattern.permute.xlu1 %v3431_v1  ;;  %2890 = vmatprep.subr.bf16.mxu1 %v3136_v26  ;;  %v3139_v34 = vld [vmem:[#allocation9 + $0x20] sm:$0xff]   ;;  %v3128_v35 = vld [vmem:[#allocation4 + $0x8] sm:$0xff]   ;;  %v660_v36 = vld [vmem:[%s4353_s2 + $0x30] sm:$0xff]  ;;  %v680_v37 = vadd.s32 128, %v659_v33 }
  0x79   :  { %289 = vmatpush1.bf16.msra.mxu0 %v3111_v7  ;;  %3099 = vset.pattern.permute.xlu0 %v3430_v0  ;;  %v3140_v38 = vld [vmem:[#allocation9 + $0x28] sm:$0xff]   ;;  %v661_v39 = vld [vmem:[%s4353_s2 + $0x38] sm:$0xff]  ;;  %v662_v40 = vld [vmem:[%s4353_s2 + $0x40] sm:$0xff]  ;;  %v681_v43 = vadd.s32 128, %v660_v36 }
  0x7a   :  { %290 = vmatprep.subr.bf16.mxu0 %v3112_v8  ;;  %743 = vperm.xlu1 %3101, %v676_v18   ;;  %v663_v41 = vld [vmem:[%s4353_s2 + $0x48] sm:$0xff]  ;;  %v664_v42 = vld [vmem:[%s4353_s2 + $0x50] sm:$0xff]  ;;  %v682_v46 = vadd.s32 128, %v661_v39  ;;  %v683_v47 = vadd.s32 128, %v662_v40  ;;  %v3130_v50 = vld [vmem:[#allocation4 + $0x18] sm:$0xff]  }
  0x7b   :  { %692 = vperm.xlu0 %3099, %v654_v13   ;;  %2891 = vmatpush3.bf16.msra.mxu1 %v3136_v26  ;;  %v3141_v44 = vld [vmem:[#allocation9 + $0x30] sm:$0xff]   ;;  %v684_v48 = vadd.s32 128, %v663_v41  ;;  %v685_v49 = vadd.s32 128, %v664_v42  ;;  %v665_v51 = vld [vmem:[%s4353_s2 + $0x58] sm:$0xff]  ;;  %v3131_v53 = vld [vmem:[#allocation4 + $0x20] sm:$0xff]  }
  0x7c   :  { %2892 = vmatprep.subr.bf16.mxu1 %v3137_v28  ;;  %v3129_v45 = vld [vmem:[#allocation4 + $0x10] sm:$0xff]   ;;  %v686_v52 = vadd.s32 128, %v665_v51  ;;  %v666_v54 = vld [vmem:[%s4353_s2 + $0x60] sm:$0xff]  ;;  %v667_v56 = vld [vmem:[%s4353_s2 + $0x68] sm:$0xff] }
  0x7d   :  { %291 = vmatpush1.bf16.msra.mxu0 %v3114_v9  ;;  %v687_v55 = vadd.s32 128, %v666_v54  ;;  %v688_v57 = vadd.s32 128, %v667_v56  ;;  %v3132_v58 = vld [vmem:[#allocation4 + $0x28] sm:$0xff]   ;;  %v668_v59 = vld [vmem:[%s4353_s2 + $0x70] sm:$0xff]  ;;  %v669_v61 = vld [vmem:[%s4353_s2 + $0x78] sm:$0xff] }
  0x7e   :  { %292 = vmatprep.subr.bf16.mxu0 %v3115_v10  ;;  %746 = vperm.xlu1 %3101, %v677_v22   ;;  %v689_v60 = vadd.s32 128, %v668_v59  ;;  %v690_v62 = vadd.s32 128, %v669_v61  ;;  %v3133_v63 = vld [vmem:[#allocation4 + $0x30] sm:$0xff]   ;;  %v3134_v2 = vld [vmem:[#allocation4 + $0x38] sm:$0xff]   ;;  %v3143_v4 = vld [vmem:[#allocation7] sm:$0xff]   ;;  %v670_v10 = vlaneseq }
  0x7f   :  { %698 = vperm.xlu0 %3099, %v656_v19   ;;  %2893 = vmatpush3.bf16.msra.mxu1 %v3137_v28  ;;  %v3142_v3 = vld [vmem:[#allocation9 + $0x38] sm:$0xff]   ;;  %v3144_v5 = vld [vmem:[#allocation7 + $0x8] sm:$0xff]   ;;  %v3145_v6 = vld [vmem:[#allocation7 + $0x10] sm:$0xff]  }
  0x80   :  { %2894 = vmatprep.subr.bf16.mxu1 %v3138_v32  ;;  %2904 = vmatprep.mubr.bf16.mxu1 %v3143_v4  ;;  %v3146_v7 = vld [vmem:[#allocation7 + $0x18] sm:$0xff]   ;;  %v3147_v8 = vld [vmem:[#allocation7 + $0x20] sm:$0xff]   ;;  %v3148_v9 = vld [vmem:[#allocation7 + $0x28] sm:$0xff]  }
  0x81   :  { %293 = vmatpush1.bf16.msra.mxu0 %v3117_v11  ;;  %v3149_v11 = vld [vmem:[#allocation7 + $0x30] sm:$0xff]   ;;  %v3151_v16 = vld [vmem:[#allocation10] ss:$12 sps:$4 sm:$0xff]   ;;  %v3156_v18 = vld [vmem:[#allocation10 + $0x1c] ss:$12 sps:$4 sm:$0xff]  }
  0x82   :  { %294 = vmatprep.subr.bf16.mxu0 %v3118_v12  ;;  %749 = vperm.xlu1 %3101, %v678_v29   ;;  %v3150_v12 = vld [vmem:[#allocation7 + $0x38] sm:$0xff]  }
  0x83   :  { %701 = vperm.xlu0 %3099, %v657_v23   ;;  %2895 = vmatpush3.bf16.msra.mxu1 %v3138_v32 }
  0x84   :  { %2896 = vmatprep.subr.bf16.mxu1 %v3139_v34 }
  0x85   :  { %295 = vmatpush1.bf16.msra.mxu0 %v3120_v14 }
  0x86   :  { %296 = vmatprep.subr.bf16.mxu0 %v3121_v17  ;;  %752 = vperm.xlu1 %3101, %v679_v31   ;;  %v3153_v17 = vld [vmem:[#allocation10 + $0x4] ss:$12 sps:$4 sm:$0xff]  }
  0x87   :  { %704 = vperm.xlu0 %3099, %v658_v27   ;;  %2897 = vmatpush3.bf16.msra.mxu1 %v3139_v34  ;;  %v3157_v27 = vld [vmem:[#allocation10 + $0x30] ss:$12 sps:$4 sm:$0xff]   ;;  %v3162_v34 = vld [vmem:[#allocation10 + $0x4c] ss:$12 sps:$4 sm:$0xff]  }
  0x88   :  { %2898 = vmatprep.subr.bf16.mxu1 %v3140_v38 }
  0x89   :  { %297 = vmatpush1.bf16.msra.mxu0 %v3123_v20 }
  0x8a   :  { %298 = vmatprep.subr.bf16.mxu0 %v3124_v21  ;;  %755 = vperm.xlu1 %3101, %v680_v37   ;;  %v3154_v21 = vld [vmem:[#allocation10 + $0x18] ss:$12 sps:$4 sm:$0xff]  }
  0x8b   :  { %707 = vperm.xlu0 %3099, %v659_v33   ;;  %2899 = vmatpush3.bf16.msra.mxu1 %v3140_v38  ;;  %v3160_v33 = vld [vmem:[#allocation10 + $0x48] ss:$12 sps:$4 sm:$0xff]   ;;  %v3167_v37 = vld [vmem:[#allocation10 + $0x64] ss:$12 sps:$4 sm:$0xff]  }
  0x8c   :  { %2900 = vmatprep.subr.bf16.mxu1 %v3141_v44 }
  0x8d   :  { %299 = vmatpush1.bf16.msra.mxu0 %v3126_v25  ;;  %v3159_v25 = vld [vmem:[#allocation10 + $0x34] ss:$12 sps:$4 sm:$0xff]  }
  0x8e   :  { %758 = vperm.xlu1 %3101, %v681_v43   ;;  %1325 = vmatprep.subr.bf16.mxu0 %v3153_v17 }
  0x8f   :  { %710 = vperm.xlu0 %3099, %v660_v36   ;;  %2901 = vmatpush3.bf16.msra.mxu1 %v3141_v44  ;;  %v3165_v36 = vld [vmem:[#allocation10 + $0x60] ss:$12 sps:$4 sm:$0xff]  }
  0x90   :  { %317 = vmatmul.mubr.bf16.vlgmr.msra.gmra.mrb[0].mxu0 %v3127_v30  ;;  %2902 = vmatprep.subr.bf16.mxu1 %v3142_v3 }
  0x91   :  { %326 = vmatprep.mubr.bf16.mxu0 %v3430_v0  ;;  %1326 = vmatpush1.bf16.msra.mxu0 %v3151_v16 }
  0x92   :  { %761 = vperm.xlu1 %3101, %v682_v46   ;;  %1327 = vmatprep.subr.bf16.mxu0 %v3156_v18 }
  0x93   :  { %713 = vperm.xlu0 %3099, %v661_v39   ;;  %2903 = vmatpush3.bf16.msra.mxu1 %v3142_v3 }
  0x95   :  { %1328 = vmatpush1.bf16.msra.mxu0 %v3154_v21 }
  0x96   :  { %764 = vperm.xlu1 %3101, %v683_v47   ;;  %2905 = vmatmul.mubr.bf16.vlgmr.msra.gmra.mrb[0].mxu1 %v3144_v5 }
  0x97   :  { %716 = vperm.xlu0 %3099, %v662_v40   ;;  %2908 = vmatprep.mubr.bf16.mxu1 %v3145_v6 }
  0x98   :  { %327 = vmatmul.mubr.bf16.gmra.mrb[4].mxu0 %v3128_v35  ;;  %1329 = vmatprep.subr.bf16.mxu0 %v3159_v25  ;;  %v3163_v25 = vld [vmem:[#allocation10 + $0x8] ss:$12 sps:$4 sm:$0xff]  }
  0x99   :  { %336 = vmatprep.mubr.bf16.mxu0 %v3430_v0  ;;  %1330 = vmatpush1.bf16.msra.mxu0 %v3157_v27  ;;  %v3164_v27 = vld [vmem:[#allocation10 + $0x20] ss:$12 sps:$4 sm:$0xff]  }
  0x9a   :  { %767 = vperm.xlu1 %3101, %v684_v48   ;;  %1331 = vmatprep.subr.bf16.mxu0 %v3162_v34 }
  0x9b   :  { %719 = vperm.xlu0 %3099, %v663_v41  }
  0x9d   :  { %1332 = vmatpush1.bf16.msra.mxu0 %v3160_v33 }
  0x9e   :  { %770 = vperm.xlu1 %3101, %v685_v49   ;;  %2909 = vmatmul.mubr.bf16.gmra.mrb[4].mxu1 %v3146_v7 }
  0x9f   :  { %722 = vperm.xlu0 %3099, %v664_v42   ;;  %2912 = vmatprep.mubr.bf16.mxu1 %v3147_v8 }
  0xa0   :  { %337 = vmatmul.mubr.bf16.gmra.mrb[8].mxu0 %v3129_v45  ;;  %1333 = vmatprep.subr.bf16.mxu0 %v3167_v37 }
  0xa1   :  { %346 = vmatprep.mubr.bf16.mxu0 %v3430_v0  ;;  %1334 = vmatpush1.bf16.msra.mxu0 %v3165_v36 }
  0xa2   :  { %773 = vperm.xlu1 %3101, %v686_v52  }
  0xa3   :  { %725 = vperm.xlu0 %3099, %v665_v51  }
  0xa6   :  { %776 = vperm.xlu1 %3101, %v687_v55   ;;  %2913 = vmatmul.mubr.bf16.gmra.mrb[8].mxu1 %v3148_v9 }
  0xa7   :  { %728 = vperm.xlu0 %3099, %v666_v54   ;;  %2916 = vmatprep.mubr.bf16.mxu1 %v3149_v11 }
  0xa8   :  { %347 = vmatmul.mubr.bf16.gmra.mrb[12].mxu0 %v3130_v50 }
  0xa9   :  { %356 = vmatprep.mubr.bf16.mxu0 %v3430_v0 }
  0xaa   :  { %779 = vperm.xlu1 %3101, %v688_v57  }
  0xab   :  { %731 = vperm.xlu0 %3099, %v667_v56  }
  0xae   :  { %782 = vperm.xlu1 %3101, %v689_v60   ;;  %2917 = vmatmul.mubr.bf16.gmra.mrb[12].mxu1 %v3150_v12 }
  0xaf   :  { %734 = vperm.xlu0 %3099, %v668_v59  }
  0xb0   :  { %357 = vmatmul.mubr.bf16.gmra.mrb[16].mxu0 %v3131_v53 }
  0xb1   :  { %366 = vmatprep.mubr.bf16.mxu0 %v3430_v0 }
  0xb2   :  { %785 = vperm.xlu1 %3101, %v690_v62  }
  0xb3   :  { %737 = vperm.xlu0 %3099, %v669_v61  }
  0xb7   :  { %3102 = vset.pattern.permute.xlu0 %v3431_v1  ;;  %v3717_v1 = vand.u32 127, %v670_v10 }
  0xb8   :  { %367 = vmatmul.mubr.bf16.gmra.mrb[20].mxu0 %v3132_v58 }
  0xb9   :  { %376 = vmatprep.mubr.bf16.mxu0 %v3430_v0  ;;  %v3720_v13 = vadd.s32 128, %v3717_v1 }
  0xc0   :  { %377 = vmatmul.mubr.bf16.gmra.mrb[24].mxu0 %v3133_v63 }
  0xc1   :  { %386 = vmatprep.mubr.bf16.mxu0 %v3430_v0 }
  0xc8   :  { %387 = vmatmul.mubr.bf16.gmra.mrb[28].mxu0 %v3134_v2 }
  0xc9   :  { %1357 = vmatprep.mubr.bf16.mxu0 %v3430_v0 }
  0xf3   :  { %v696_v50 = vpop.permute.xlu1 %695 }
  0xf4   :  { %v741_v14 = vpop.permute.xlu0 %740  ;;  %vm821_vm3 = vcmp.eq.s32.totalorder %v3717_v1, %v696_v50 }
  0xf5   :  { %vm820_vm0 = vcmp.eq.s32.totalorder %v3720_v13, %v741_v14 }
  0xf6   :  { %2528 = vmatprep.mubr.msk.f32.mxu1 %vm820_vm0, %v3432_v15 }
  0xf9   :  { %v744_v54 = vpop.permute.xlu1 %743 }
  0xfa   :  { %v693_v58 = vpop.permute.xlu0 %692  ;;  %vm822_vm2 = vcmp.eq.s32.totalorder %v3720_v13, %v744_v54 }
  0xfb   :  { %vm819_vm1 = vcmp.eq.s32.totalorder %v3717_v1, %v693_v58 }
  0xfd   :  { %v747_v60 = vpop.permute.xlu1 %746 }
  0xfe   :  { %v699_v3 = vpop.permute.xlu0 %698  ;;  %vm824_vm4 = vcmp.eq.s32.totalorder %v3720_v13, %v747_v60 }
  0xff   :  { %vm823_vm5 = vcmp.eq.s32.totalorder %v3717_v1, %v699_v3  ;;  %v3169_v3 = vld [vmem:[#allocation10 + $0x78] ss:$12 sps:$4 sm:$0xff]  }
 0x101   :  { %v750_v5 = vpop.permute.xlu1 %749 }
 0x102   :  { %v702_v8 = vpop.permute.xlu0 %701  ;;  %vm826_vm6 = vcmp.eq.s32.totalorder %v3720_v13, %v750_v5  ;;  %v3176_v5 = vld [vmem:[#allocation10 + $0x68] ss:$12 sps:$4 sm:$0xff]  }
 0x103   :  { %vm825_vm7 = vcmp.eq.s32.totalorder %v3717_v1, %v702_v8  ;;  %v3180_v8 = vld [vmem:[#allocation10 + $0x80] ss:$12 sps:$4 sm:$0xff]  }
 0x105   :  { %v753_v16 = vpop.permute.xlu1 %752 }
 0x106   :  { %v705_v17 = vpop.permute.xlu0 %704  ;;  %vm828_vm8 = vcmp.eq.s32.totalorder %v3720_v13, %v753_v16 }
 0x107   :  { %vm827_vm9 = vcmp.eq.s32.totalorder %v3717_v1, %v705_v17 }
 0x109   :  { %v756_v21 = vpop.permute.xlu1 %755 }
 0x10a   :  { %vm830_vm10 = vcmp.eq.s32.totalorder %v3720_v13, %v756_v21 }
 0x163   :  { %v318_v19 = vpop.f32.mrb[0].mxu0 }
 0x164   :  { %v320_v20 = vpop.f32.mrb[1].mxu0 }
 0x165   :  { %v322_v22 = vpop.f32.mrb[2].mxu0 }
 0x166   :  { %v3018_v23 = vpack.c.bf16 %v322_v22, %v318_v19  ;;  %v324_v24 = vpop.f32.mrb[3].mxu0 }
 0x167   :  { %v3016_v26 = vpack.c.bf16 %v324_v24, %v320_v20 }
 0x169   :  { %3017 = vmatprep.subr.bf16.mxu1 %v3016_v26  ;;  %v708_v26 = vpop.permute.xlu0 %707  ;;  %v3751_v37 = vpop.f32.mrb[0].mxu1 }
 0x16a   :  { %3019 = vmatpush3.bf16.msra.mxu1 %v3018_v23  ;;  %vm829_vm11 = vcmp.eq.s32.totalorder %v3717_v1, %v708_v26 }
 0x16b   :  { %v328_v28 = vpop.f32.mrb[4].mxu0 }
 0x16c   :  { %v330_v29 = vpop.f32.mrb[5].mxu0 }
 0x16d   :  { %v332_v30 = vpop.f32.mrb[6].mxu0 }
 0x16e   :  { %v3022_v31 = vpack.c.bf16 %v332_v30, %v328_v28  ;;  %v334_v32 = vpop.f32.mrb[7].mxu0  ;;  %v759_v28 = vpop.permute.xlu1 %758 }
 0x16f   :  { %v3020_v35 = vpack.c.bf16 %v334_v32, %v330_v29  ;;  %v711_v29 = vpop.permute.xlu0 %710  ;;  %vm832_vm12 = vcmp.eq.s32.totalorder %v3720_v13, %v759_v28 }
 0x170   :  { %vm831_vm13 = vcmp.eq.s32.totalorder %v3717_v1, %v711_v29 }
 0x171   :  { %3021 = vmatprep.subr.bf16.mxu1 %v3020_v35 }
 0x172   :  { %3023 = vmatpush3.bf16.msra.mxu1 %v3022_v31  ;;  %v762_v30 = vpop.permute.xlu1 %761 }
 0x173   :  { %v338_v38 = vpop.f32.mrb[8].mxu0  ;;  %v714_v31 = vpop.permute.xlu0 %713  ;;  %vm834_vm14 = vcmp.eq.s32.totalorder %v3720_v13, %v762_v30 }
 0x174   :  { %v340_v39 = vpop.f32.mrb[9].mxu0  ;;  %vm833_vm15 = vcmp.eq.s32.totalorder %v3717_v1, %v714_v31 }
 0x175   :  { %v342_v40 = vpop.f32.mrb[10].mxu0 }
 0x176   :  { %v3026_v41 = vpack.c.bf16 %v342_v40, %v338_v38  ;;  %v344_v42 = vpop.f32.mrb[11].mxu0  ;;  %v765_v32 = vpop.permute.xlu1 %764 }
 0x177   :  { %v3024_v43 = vpack.c.bf16 %v344_v42, %v340_v39  ;;  %v717_v33 = vpop.permute.xlu0 %716  ;;  %v3754_v38 = vpop.f32.mrb[1].mxu1  ;;  %vm836_vm0 = vcmp.eq.s32.totalorder %v3720_v13, %v765_v32 }
 0x178   :  { %v3756_v40 = vpop.f32.mrb[2].mxu1 }
 0x179   :  { %3025 = vmatprep.subr.bf16.mxu1 %v3024_v43 }
 0x17a   :  { %3027 = vmatpush3.bf16.msra.mxu1 %v3026_v41  ;;  %v768_v34 = vpop.permute.xlu1 %767  ;;  %v3759_v41 = vpop.f32.mrb[3].mxu1 }
 0x17b   :  { %v348_v44 = vpop.f32.mrb[12].mxu0  ;;  %v720_v35 = vpop.permute.xlu0 %719 }
 0x17c   :  { %v350_v45 = vpop.f32.mrb[13].mxu0 }
 0x17d   :  { %v352_v46 = vpop.f32.mrb[14].mxu0 }
 0x17e   :  { %v3030_v47 = vpack.c.bf16 %v352_v46, %v348_v44  ;;  %v354_v48 = vpop.f32.mrb[15].mxu0  ;;  %v771_v36 = vpop.permute.xlu1 %770 }
 0x17f   :  { %v3028_v49 = vpack.c.bf16 %v354_v48, %v350_v45  ;;  %v723_v39 = vpop.permute.xlu0 %722 }
 0x181   :  { %3029 = vmatprep.subr.bf16.mxu1 %v3028_v49 }
 0x182   :  { %3031 = vmatpush3.bf16.msra.mxu1 %v3030_v47  ;;  %v774_v42 = vpop.permute.xlu1 %773 }
 0x183   :  { %v358_v51 = vpop.f32.mrb[16].mxu0  ;;  %v726_v43 = vpop.permute.xlu0 %725 }
 0x184   :  { %v360_v52 = vpop.f32.mrb[17].mxu0 }
 0x185   :  { %v362_v53 = vpop.f32.mrb[18].mxu0 }
 0x186   :  { %v3034_v55 = vpack.c.bf16 %v362_v53, %v358_v51  ;;  %v364_v56 = vpop.f32.mrb[19].mxu0  ;;  %v777_v44 = vpop.permute.xlu1 %776 }
 0x187   :  { %v3032_v57 = vpack.c.bf16 %v364_v56, %v360_v52  ;;  %v729_v45 = vpop.permute.xlu0 %728  ;;  %v3791_v52 = vpop.f32.mrb[4].mxu1 }
 0x188   :  { %v3794_v53 = vpop.f32.mrb[5].mxu1 }
 0x189   :  { %3033 = vmatprep.subr.bf16.mxu1 %v3032_v57  ;;  %v3796_v54 = vpop.f32.mrb[6].mxu1 }
 0x18a   :  { %3035 = vmatpush3.bf16.msra.mxu1 %v3034_v55  ;;  %v780_v46 = vpop.permute.xlu1 %779  ;;  %v3799_v55 = vpop.f32.mrb[7].mxu1 }
 0x18b   :  { %v368_v59 = vpop.f32.mrb[20].mxu0  ;;  %v732_v47 = vpop.permute.xlu0 %731 }
 0x18c   :  { %v370_v61 = vpop.f32.mrb[21].mxu0  ;;  %v3802_v56 = vpop.f32.mrb[8].mxu1 }
 0x18d   :  { %v372_v62 = vpop.f32.mrb[22].mxu0  ;;  %v3804_v57 = vpop.f32.mrb[9].mxu1 }
 0x18e   :  { %v3038_v63 = vpack.c.bf16 %v372_v62, %v368_v59  ;;  %v374_v2 = vpop.f32.mrb[23].mxu0  ;;  %v783_v48 = vpop.permute.xlu1 %782 }
 0x18f   :  { %v3036_v4 = vpack.c.bf16 %v374_v2, %v370_v61  ;;  %v735_v49 = vpop.permute.xlu0 %734  ;;  %v3172_v2 = vld [vmem:[#allocation10 + $0x50] ss:$12 sps:$4 sm:$0xff]  }
 0x191   :  { %3037 = vmatprep.subr.bf16.mxu1 %v3036_v4  ;;  %v3175_v4 = vld [vmem:[#allocation10 + $0x94] ss:$12 sps:$4 sm:$0xff]  }
 0x192   :  { %3039 = vmatpush3.bf16.msra.mxu1 %v3038_v63  ;;  %v786_v50 = vpop.permute.xlu1 %785  ;;  %v3171_v63 = vld [vmem:[#allocation10 + $0x7c] ss:$12 sps:$4 sm:$0xff]  }
 0x193   :  { %v378_v6 = vpop.f32.mrb[24].mxu0  ;;  %v738_v51 = vpop.permute.xlu0 %737  ;;  %1335 = vmatprep.subr.bf16.mxu0 %v3171_v63 }
 0x194   :  { %v380_v7 = vpop.f32.mrb[25].mxu0  ;;  %1336 = vmatpush1.bf16.msra.mxu0 %v3169_v3 }
 0x195   :  { %v382_v9 = vpop.f32.mrb[26].mxu0  ;;  %1337 = vmatprep.subr.bf16.mxu0 %v3175_v4 }
 0x196   :  { %v3042_v11 = vpack.c.bf16 %v382_v9, %v378_v6  ;;  %v384_v12 = vpop.f32.mrb[27].mxu0  ;;  %v3173_v6 = vld [vmem:[#allocation10 + $0x90] ss:$12 sps:$4 sm:$0xff]   ;;  %v3177_v9 = vld [vmem:[#allocation10 + $0xa8] ss:$12 sps:$4 sm:$0xff]  }
 0x197   :  { %v3040_v14 = vpack.c.bf16 %v384_v12, %v380_v7  ;;  %v3179_v7 = vld [vmem:[#allocation10 + $0xac] ss:$12 sps:$4 sm:$0xff]   ;;  %v3182_v12 = vld [vmem:[#allocation10 + $0xb0] ss:$12 sps:$4 sm:$0xff]  }
 0x198   :  { %1338 = vmatpush1.bf16.msra.mxu0 %v3173_v6 }
 0x199   :  { %3041 = vmatprep.subr.bf16.mxu1 %v3040_v14  ;;  %1339 = vmatprep.subr.bf16.mxu0 %v3179_v7  ;;  %v3819_v14 = vshrl.u32 %v670_v10, 7 }
 0x19a   :  { %3043 = vmatpush3.bf16.msra.mxu1 %v3042_v11  ;;  %v3181_v11 = vld [vmem:[#allocation10 + $0x98] ss:$12 sps:$4 sm:$0xff]  }
 0x19b   :  { %v388_v18 = vpop.f32.mrb[28].mxu0  ;;  %v1094_v17 = vsub.s32 0, %v3819_v14 }
 0x19c   :  { %v390_v19 = vpop.f32.mrb[29].mxu0  ;;  %1340 = vmatpush1.bf16.msra.mxu0 %v3177_v9 }
 0x19d   :  { %v392_v20 = vpop.f32.mrb[30].mxu0 }
 0x19e   :  { %v3046_v22 = vpack.c.bf16 %v392_v20, %v388_v18  ;;  %v394_v23 = vpop.f32.mrb[31].mxu0  ;;  %v3825_v18 = vld [vmem:[%s4360_s9] sm:$0xff] }
 0x19f   :  { %v3044_v24 = vpack.c.bf16 %v394_v23, %v390_v19 }
 0x1a1   :  { %3045 = vmatprep.subr.bf16.mxu1 %v3044_v24 }
 0x1a2   :  { %3047 = vmatpush3.bf16.msra.mxu1 %v3046_v22  ;;  %v3831_v22 = vrot.slane %v3825_v18, %v1094_v17 }
 0x1a3   :  { %2920 = vmatprep.subr.bf16.mxu1 %v3163_v25 }
 0x1a5   :  { %2529 = vmatmul.mubr.msk.f32.vlgmr.msra.gmra.mrb[16].mxu1 %vm819_vm1, %v3432_v15  ;;  %vm835_vm1 = vcmp.eq.s32.totalorder %v3717_v1, %v717_v33 }
 0x1a6   :  { %2530 = vmatprep.mubr.msk.f32.mxu1 %vm822_vm2, %v3432_v15  ;;  %2921 = vmatpush3.bf16.msra.mxu1 %v3163_v25  ;;  %vm838_vm2 = vcmp.eq.s32.totalorder %v3720_v13, %v768_v34 }
 0x1a7   :  { %2922 = vmatprep.subr.bf16.mxu1 %v3164_v27 }
 0x1a9   :  { %2531 = vmatmul.mubr.msk.f32.gmra.mrb[18].mxu1 %vm821_vm3, %v3432_v15  ;;  %vm837_vm3 = vcmp.eq.s32.totalorder %v3717_v1, %v720_v35 }
 0x1aa   :  { %2532 = vmatprep.mubr.msk.f32.mxu1 %vm824_vm4, %v3432_v15  ;;  %2923 = vmatpush3.bf16.msra.mxu1 %v3164_v27  ;;  %vm840_vm4 = vcmp.eq.s32.totalorder %v3720_v13, %v771_v36 }
 0x1ad   :  { %2533 = vmatmul.mubr.msk.f32.gmra.mrb[20].mxu1 %vm823_vm5, %v3432_v15  ;;  %vm839_vm5 = vcmp.eq.s32.totalorder %v3717_v1, %v723_v39 }
 0x1ae   :  { %2534 = vmatprep.mubr.msk.f32.mxu1 %vm826_vm6, %v3432_v15  ;;  %vm842_vm6 = vcmp.eq.s32.totalorder %v3720_v13, %v774_v42 }
 0x1b1   :  { %2535 = vmatmul.mubr.msk.f32.gmra.mrb[22].mxu1 %vm825_vm7, %v3432_v15  ;;  %vm841_vm7 = vcmp.eq.s32.totalorder %v3717_v1, %v726_v43 }
 0x1b2   :  { %2536 = vmatprep.mubr.msk.f32.mxu1 %vm828_vm8, %v3432_v15  ;;  %vm844_vm8 = vcmp.eq.s32.totalorder %v3720_v13, %v777_v44 }
 0x1b5   :  { %2537 = vmatmul.mubr.msk.f32.gmra.mrb[24].mxu1 %vm827_vm9, %v3432_v15  ;;  %vm843_vm9 = vcmp.eq.s32.totalorder %v3717_v1, %v729_v45 }
 0x1b6   :  { %2538 = vmatprep.mubr.msk.f32.mxu1 %vm830_vm10, %v3432_v15  ;;  %vm846_vm10 = vcmp.eq.s32.totalorder %v3720_v13, %v780_v46 }
 0x1b9   :  { %2539 = vmatmul.mubr.msk.f32.gmra.mrb[26].mxu1 %vm829_vm11, %v3432_v15  ;;  %vm845_vm11 = vcmp.eq.s32.totalorder %v3717_v1, %v732_v47 }
 0x1ba   :  { %2540 = vmatprep.mubr.msk.f32.mxu1 %vm832_vm12, %v3432_v15  ;;  %vm848_vm12 = vcmp.eq.s32.totalorder %v3720_v13, %v783_v48 }
 0x1bd   :  { %2541 = vmatmul.mubr.msk.f32.gmra.mrb[28].mxu1 %vm831_vm13, %v3432_v15  ;;  %vm847_vm13 = vcmp.eq.s32.totalorder %v3717_v1, %v735_v49 }
 0x1be   :  { %2542 = vmatprep.mubr.msk.f32.mxu1 %vm834_vm14, %v3432_v15  ;;  %vm850_vm14 = vcmp.eq.s32.totalorder %v3720_v13, %v786_v50  ;;  %v3806_v13 = vpop.f32.mrb[10].mxu1 }
 0x1bf   :  { %v3808_v58 = vpop.f32.mrb[11].mxu1 }
 0x1c0   :  { %v3810_v59 = vpop.f32.mrb[12].mxu1 }
 0x1c1   :  { %2543 = vmatmul.mubr.msk.f32.gmra.mrb[30].mxu1 %vm833_vm15, %v3432_v15  ;;  %vm849_vm15 = vcmp.eq.s32.totalorder %v3717_v1, %v738_v51  ;;  %v3812_v60 = vpop.f32.mrb[13].mxu1  ;;  %v3168_v1 = vld [vmem:[#allocation10 + $0x38] ss:$12 sps:$4 sm:$0xff]  }
 0x1c2   :  { %2544 = vmatprep.mubr.msk.f32.mxu1 %vm836_vm0, %v3432_v15  ;;  %v3814_v61 = vpop.f32.mrb[14].mxu1  ;;  %2924 = vmatprep.subr.bf16.mxu1 %v3168_v1 }
 0x1c3   :  { %v3816_v62 = vpop.f32.mrb[15].mxu1  ;;  %2925 = vmatpush3.bf16.msra.mxu1 %v3168_v1 }
 0x1c4   :  { %2926 = vmatprep.subr.bf16.mxu1 %v3172_v2 }
 0x1c5   :  { %2545 = vmatmul.mubr.msk.f32.gmra.mrb[32].mxu1 %vm835_vm1, %v3432_v15 }
 0x1c6   :  { %2546 = vmatprep.mubr.msk.f32.mxu1 %vm838_vm2, %v3432_v15 }
 0x1c7   :  { %2927 = vmatpush3.bf16.msra.mxu1 %v3172_v2 }
 0x1c8   :  { %2928 = vmatprep.subr.bf16.mxu1 %v3176_v5 }
 0x1c9   :  { %2547 = vmatmul.mubr.msk.f32.gmra.mrb[34].mxu1 %vm837_vm3, %v3432_v15 }
 0x1ca   :  { %2548 = vmatprep.mubr.msk.f32.mxu1 %vm840_vm4, %v3432_v15 }
 0x1cb   :  { %2929 = vmatpush3.bf16.msra.mxu1 %v3176_v5 }
 0x1cc   :  { %2930 = vmatprep.subr.bf16.mxu1 %v3180_v8 }
 0x1cd   :  { %2549 = vmatmul.mubr.msk.f32.gmra.mrb[36].mxu1 %vm839_vm5, %v3432_v15 }
 0x1ce   :  { %2550 = vmatprep.mubr.msk.f32.mxu1 %vm842_vm6, %v3432_v15 }
 0x1cf   :  { %2931 = vmatpush3.bf16.msra.mxu1 %v3180_v8 }
 0x1d0   :  { %2932 = vmatprep.subr.bf16.mxu1 %v3181_v11 }
 0x1d1   :  { %2551 = vmatmul.mubr.msk.f32.gmra.mrb[38].mxu1 %vm841_vm7, %v3432_v15 }
 0x1d2   :  { %2552 = vmatprep.mubr.msk.f32.mxu1 %vm844_vm8, %v3432_v15 }
 0x1d3   :  { %2933 = vmatpush3.bf16.msra.mxu1 %v3181_v11 }
 0x1d4   :  { %2934 = vmatprep.subr.bf16.mxu1 %v3182_v12 }
 0x1d5   :  { %2553 = vmatmul.mubr.msk.f32.gmra.mrb[40].mxu1 %vm843_vm9, %v3432_v15 }
 0x1d6   :  { %2554 = vmatprep.mubr.msk.f32.mxu1 %vm846_vm10, %v3432_v15 }
 0x1d7   :  { %2935 = vmatpush3.bf16.msra.mxu1 %v3182_v12 }
 0x1d9   :  { %2555 = vmatmul.mubr.msk.f32.gmra.mrb[42].mxu1 %vm845_vm11, %v3432_v15 }
 0x1da   :  { %2556 = vmatprep.mubr.msk.f32.mxu1 %vm848_vm12, %v3432_v15 }
 0x1dd   :  { %2557 = vmatmul.mubr.msk.f32.gmra.mrb[44].mxu1 %vm847_vm13, %v3432_v15 }
 0x1de   :  { %2558 = vmatprep.mubr.msk.f32.mxu1 %vm850_vm14, %v3432_v15 }
 0x1e1   :  { %2559 = vmatmul.mubr.msk.f32.gmra.mrb[46].mxu1 %vm849_vm15, %v3432_v15 }
 0x278   :  { %v2712_v16 = vpop.f32.mrb[16].mxu1 }
 0x279   :  { %v2713_v19 = vpop.f32.mrb[17].mxu1 }
 0x27a   :  { %v2714_v20 = vadd.f32 %v2713_v19, %v2712_v16 }
 0x27c   :  { %v1014_v21 = vadd.f32 %v2714_v20, %v3754_v38  ;;  %v2715_v23 = vpop.f32.mrb[18].mxu1 }
 0x27d   :  { %v2716_v10 = vpop.f32.mrb[19].mxu1 }
 0x27e   :  { %v2717_v24 = vadd.f32 %v2716_v10, %v2715_v23  ;;  %v1096_v25 = vadd.f32 %v3831_v22, %v1014_v21 }
 0x280   :  { %v1019_v26 = vadd.f32 %v2717_v24, %v3759_v41  ;;  %v2718_v27 = vpop.f32.mrb[20].mxu1  ;;  %v1112_v31 = vmax.f32 %v1096_v25, 0.0 }
 0x281   :  { %v2719_v28 = vpop.f32.mrb[21].mxu1 }
 0x282   :  { %v1097_v29 = vadd.f32 %v3831_v22, %v1019_v26  ;;  %v2720_v30 = vadd.f32 %v2719_v28, %v2718_v27 }
 0x284   :  { %v1113_v32 = vmax.f32 %v1097_v29, 0.0  ;;  %v1024_v33 = vadd.f32 %v3751_v37, %v2720_v30  ;;  %v2721_v34 = vpop.f32.mrb[22].mxu1 }
 0x285   :  { %v2722_v35 = vpop.f32.mrb[23].mxu1 }
 0x286   :  { %v1128_v36 = vpack.c.bf16 %v1113_v32, %v1112_v31  ;;  %v2723_v38 = vadd.f32 %v2722_v35, %v2721_v34  ;;  %v1098_v39 = vadd.f32 %v3831_v22, %v1024_v33 }
 0x288   :  { %v1029_v42 = vadd.f32 %v3756_v40, %v2723_v38  ;;  %v2724_v43 = vpop.f32.mrb[24].mxu1  ;;  %1358 = vmatmul.mubr.bf16.vlgmr.msra.gmra.mrb[32].mxu0 %v1128_v36  ;;  %2936 = vmatprep.mubr.bf16.mxu1 %v1128_v36  ;;  %v1114_v46 = vmax.f32 %v1098_v39, 0.0 }
 0x289   :  { %v2725_v41 = vpop.f32.mrb[25].mxu1  ;;  %1367 = vmatprep.mubr.bf16.mxu0 %v3430_v0 }
 0x28a   :  { %v1099_v44 = vadd.f32 %v3831_v22, %v1029_v42  ;;  %v2726_v45 = vadd.f32 %v2725_v41, %v2724_v43 }
 0x28c   :  { %v1115_v47 = vmax.f32 %v1099_v44, 0.0  ;;  %v1034_v37 = vadd.f32 %v2726_v45, %v3794_v53  ;;  %v2727_v48 = vpop.f32.mrb[26].mxu1 }
 0x28d   :  { %v2728_v49 = vpop.f32.mrb[27].mxu1 }
 0x28e   :  { %v2729_v50 = vadd.f32 %v2728_v49, %v2727_v48  ;;  %v1129_v51 = vpack.c.bf16 %v1115_v47, %v1114_v46  ;;  %v1100_v1 = vadd.f32 %v3831_v22, %v1034_v37 }
 0x290   :  { %v1039_v40 = vadd.f32 %v2729_v50, %v3799_v55  ;;  %v2730_v63 = vpop.f32.mrb[28].mxu1  ;;  %1368 = vmatmul.mubr.bf16.gmra.mrb[36].mxu0 %v1129_v51  ;;  %2937 = vmatmul.mubr.bf16.vlgmr.msra.gmra.mrb[48].mxu1 %v1129_v51  ;;  %v1116_v5 = vmax.f32 %v1100_v1, 0.0 }
 0x291   :  { %v2731_v2 = vpop.f32.mrb[29].mxu1  ;;  %1377 = vmatprep.mubr.bf16.mxu0 %v3430_v0 }
 0x292   :  { %v1101_v3 = vadd.f32 %v3831_v22, %v1039_v40  ;;  %v2732_v4 = vadd.f32 %v2731_v2, %v2730_v63 }
 0x294   :  { %v1117_v6 = vmax.f32 %v1101_v3, 0.0  ;;  %v1044_v53 = vadd.f32 %v3791_v52, %v2732_v4  ;;  %v2733_v7 = vpop.f32.mrb[30].mxu1 }
 0x295   :  { %v2734_v8 = vpop.f32.mrb[31].mxu1 }
 0x296   :  { %v2735_v9 = vadd.f32 %v2734_v8, %v2733_v7  ;;  %v1130_v11 = vpack.c.bf16 %v1117_v6, %v1116_v5  ;;  %v1102_v12 = vadd.f32 %v3831_v22, %v1044_v53 }
 0x298   :  { %v1049_v55 = vadd.f32 %v3796_v54, %v2735_v9  ;;  %v2736_v16 = vpop.f32.mrb[32].mxu1  ;;  %1378 = vmatmul.mubr.bf16.gmra.mrb[40].mxu0 %v1130_v11  ;;  %2940 = vmatprep.mubr.bf16.mxu1 %v1130_v11  ;;  %v1118_v23 = vmax.f32 %v1102_v12, 0.0 }
 0x299   :  { %v2737_v19 = vpop.f32.mrb[33].mxu1  ;;  %1387 = vmatprep.mubr.bf16.mxu0 %v3430_v0 }
 0x29a   :  { %v1103_v20 = vadd.f32 %v3831_v22, %v1049_v55  ;;  %v2738_v21 = vadd.f32 %v2737_v19, %v2736_v16  ;;  %v1632_v16 = vld [vmem:[%s4354_s3] sm:$0x3] }
 0x29c   :  { %v1119_v10 = vmax.f32 %v1103_v20, 0.0  ;;  %v1054_v52 = vadd.f32 %v2738_v21, %v3804_v57  ;;  %v2739_v24 = vpop.f32.mrb[34].mxu1 }
 0x29d   :  { %v2740_v25 = vpop.f32.mrb[35].mxu1 }
 0x29e   :  { %v2741_v26 = vadd.f32 %v2740_v25, %v2739_v24  ;;  %v1131_v27 = vpack.c.bf16 %v1119_v10, %v1118_v23  ;;  %v1104_v28 = vadd.f32 %v3831_v22, %v1054_v52  ;;  %v3891_v23 = vrot.slane %v1632_v16, %v1094_v17 }
 0x29f   :  { %v3894_v10 = vadd.s32 8, %v3819_v14  ;;  %v3897_v52 = vadd.s32 16, %v3819_v14  ;;  %v3900_v24 = vadd.s32 24, %v3819_v14 }
 0x2a0   :  { %v1059_v54 = vadd.f32 %v2741_v26, %v3808_v58  ;;  %v2742_v29 = vpop.f32.mrb[36].mxu1  ;;  %1388 = vmatmul.mubr.bf16.gmra.mrb[44].mxu0 %v1131_v27  ;;  %2941 = vmatmul.mubr.bf16.gmra.mrb[52].mxu1 %v1131_v27  ;;  %v1120_v33 = vmax.f32 %v1104_v28, 0.0  ;;  %v3905_v26 = vadd.s32 32, %v3819_v14  ;;  %vm4363_vm1 = vcmp.eq.s32.totalorder %v3819_v14, %v3891_v23 }
 0x2a1   :  { %v2743_v30 = vpop.f32.mrb[37].mxu1  ;;  %1397 = vmatprep.mubr.bf16.mxu0 %v3430_v0  ;;  %vm1643_vm3 = vcmp.eq.s32.totalorder %v3894_v10, %v3891_v23  ;;  %vm1645_vm5 = vcmp.eq.s32.totalorder %v3897_v52, %v3891_v23  ;;  %vm4364_vm7 = vcmp.eq.s32.totalorder %v3900_v24, %v3891_v23 }
 0x2a2   :  { %v1105_v31 = vadd.f32 %v3831_v22, %v1059_v54  ;;  %v2744_v32 = vadd.f32 %v2743_v30, %v2742_v29  ;;  %v3929_v54 = vadd.s32 56, %v3819_v14  ;;  %vm4368_vm9 = vcmp.eq.s32.totalorder %v3905_v26, %v3891_v23 }
 0x2a4   :  { %v1121_v34 = vmax.f32 %v1105_v31, 0.0  ;;  %v1064_v57 = vadd.f32 %v3802_v56, %v2744_v32  ;;  %v2745_v35 = vpop.f32.mrb[38].mxu1  ;;  %v3941_v31 = vadd.s32 48, %v3819_v14  ;;  %vm4369_vm12 = vcmp.eq.s32.totalorder %v3929_v54, %v3891_v23 }
 0x2a5   :  { %v2746_v36 = vpop.f32.mrb[39].mxu1 }
 0x2a6   :  { %v2747_v38 = vadd.f32 %v2746_v36, %v2745_v35  ;;  %v1132_v39 = vpack.c.bf16 %v1121_v34, %v1120_v33  ;;  %v1106_v42 = vadd.f32 %v3831_v22, %v1064_v57  ;;  %v3945_v34 = vadd.s32 64, %v3819_v14 }
 0x2a7   :  { %v3948_v57 = vadd.s32 72, %v3819_v14  ;;  %vm4371_vm13 = vcmp.eq.s32.totalorder %v3941_v31, %v3891_v23 }
 0x2a8   :  { %v1069_v58 = vadd.f32 %v3806_v13, %v2747_v38  ;;  %v2748_v43 = vpop.f32.mrb[40].mxu1  ;;  %1398 = vmatmul.mubr.bf16.gmra.mrb[48].mxu0 %v1132_v39  ;;  %2944 = vmatprep.mubr.bf16.mxu1 %v1132_v39  ;;  %v1122_v46 = vmax.f32 %v1106_v42, 0.0  ;;  %v3952_v38 = vadd.s32 80, %v3819_v14  ;;  %v3433_v39 = vmov 0.0  }
 0x2a9   :  { %v2749_v41 = vpop.f32.mrb[41].mxu1  ;;  %1407 = vmatprep.mubr.bf16.mxu0 %v3430_v0  ;;  %v2584_v42 = vsel %vm4363_vm1, 1.0, %v3433_v39  ;;  %vm4372_vm1 = vcmp.eq.s32.totalorder %v3948_v57, %v3891_v23 }
 0x2aa   :  { %v1107_v44 = vadd.f32 %v3831_v22, %v1069_v58  ;;  %v2750_v45 = vadd.f32 %v2749_v41, %v2748_v43 }
 0x2ac   :  { %v1123_v47 = vmax.f32 %v1107_v44, 0.0  ;;  %v1074_v56 = vadd.f32 %v2750_v45, %v3812_v60  ;;  %v2751_v37 = vpop.f32.mrb[42].mxu1  ;;  %v3966_v44 = vadd.s32 88, %v3819_v14  ;;  %v3969_v45 = vadd.s32 96, %v3819_v14 }
 0x2ad   :  { %v2752_v48 = vpop.f32.mrb[43].mxu1 }
 0x2ae   :  { %v2753_v49 = vadd.f32 %v2752_v48, %v2751_v37  ;;  %v1133_v50 = vpack.c.bf16 %v1123_v47, %v1122_v46  ;;  %v1108_v51 = vadd.f32 %v3831_v22, %v1074_v56  ;;  %v3976_v56 = vadd.s32 104, %v3819_v14 }
 0x2b0   :  { %v1079_v13 = vadd.f32 %v2753_v49, %v3816_v62  ;;  %v2754_v1 = vpop.f32.mrb[44].mxu1  ;;  %1408 = vmatmul.mubr.bf16.gmra.mrb[52].mxu0 %v1133_v50  ;;  %2945 = vmatmul.mubr.bf16.gmra.mrb[56].mxu1 %v1133_v50  ;;  %v1124_v3 = vmax.f32 %v1108_v51, 0.0  ;;  %v2586_v49 = vsel %vm1643_vm3, 1.0, %v3433_v39  ;;  %v2590_v51 = vsel %vm4364_vm7, 1.0, %v3433_v39 }
 0x2b1   :  { %v2755_v40 = vpop.f32.mrb[45].mxu1  ;;  %1417 = vmatprep.mubr.bf16.mxu0 %v3430_v0 }
 0x2b2   :  { %v1109_v63 = vadd.f32 %v3831_v22, %v1079_v13  ;;  %v2756_v2 = vadd.f32 %v2755_v40, %v2754_v1  ;;  %v3183_v13 = vld [vmem:[#allocation12] sm:$0xff]  }
 0x2b3   :  { %2952 = vmatprep.subr.bf16.mxu1 %v3183_v13 }
 0x2b4   :  { %v1125_v4 = vmax.f32 %v1109_v63, 0.0  ;;  %v1084_v60 = vadd.f32 %v3810_v59, %v2756_v2  ;;  %v2757_v5 = vpop.f32.mrb[46].mxu1  ;;  %v1172_v59 = vsub.s32 1, %v3819_v14  ;;  %v2588_v2 = vsel %vm1645_vm5, 1.0, %v3433_v39  ;;  %2953 = vmatpush3.bf16.msra.mxu1 %v3183_v13 }
 0x2b5   :  { %v2758_v6 = vpop.f32.mrb[47].mxu1 }
 0x2b6   :  { %v2759_v53 = vadd.f32 %v2758_v6, %v2757_v5  ;;  %v1134_v7 = vpack.c.bf16 %v1125_v4, %v1124_v3  ;;  %v1110_v8 = vadd.f32 %v3831_v22, %v1084_v60  ;;  %v3875_v19 = vrot.slane %v1632_v16, %v1172_v59  ;;  %v3184_v3 = vld [vmem:[#allocation12 + $0x8] sm:$0xff]  }
 0x2b7   :  { %2954 = vmatprep.subr.bf16.mxu1 %v3184_v3 }
 0x2b8   :  { %v1089_v62 = vadd.f32 %v3814_v61, %v2759_v53  ;;  %1418 = vmatmul.mubr.bf16.gmra.mrb[56].mxu0 %v1134_v7  ;;  %2948 = vmatprep.mubr.bf16.mxu1 %v1134_v7  ;;  %v1126_v11 = vmax.f32 %v1110_v8, 0.0  ;;  %vm1642_vm0 = vcmp.eq.s32.totalorder %v3819_v14, %v3875_v19  ;;  %v123_v61 = vld [vmem:[%s4360_s9 + $0x8] sm:$0xf]  ;;  %vm1644_vm2 = vcmp.eq.s32.totalorder %v3894_v10, %v3875_v19 }
 0x2b9   :  { %1427 = vmatprep.mubr.bf16.mxu0 %v3430_v0  ;;  %v1176_v0 = vsub.s32 5, %v3819_v14  ;;  %v1181_v21 = vrot.slane %v123_v61, %v1172_v59  ;;  %vm1646_vm4 = vcmp.eq.s32.totalorder %v3897_v52, %v3875_v19  ;;  %vm4365_vm6 = vcmp.eq.s32.totalorder %v3900_v24, %v3875_v19  ;;  %2955 = vmatpush3.bf16.msra.mxu1 %v3184_v3  ;;  %v3188_v10 = vld [vmem:[#allocation12 + $0x28] sm:$0xff]   ;;  %v3189_v52 = vld [vmem:[#allocation12 + $0x30] sm:$0xff]  }
 0x2ba   :  { %v1111_v9 = vadd.f32 %v3831_v22, %v1089_v62  ;;  %v1173_v22 = vrot.slane %v3825_v18, %v1172_v59  ;;  %vm1650_vm8 = vcmp.eq.s32.totalorder %v3905_v26, %v3875_v19  ;;  %v2585_v58 = vsel %vm1642_vm0, 1.0, %v3433_v39 }
 0x2bb   :  { %v1177_v20 = vrot.slane %v3825_v18, %v1176_v0  ;;  %v3908_v18 = vadd.s32 40, %v3819_v14  ;;  %v3912_v17 = vrot.slane %v1181_v21, %v1172_v59  ;;  %vm4370_vm14 = vcmp.eq.s32.totalorder %v3929_v54, %v3875_v19 }
 0x2bc   :  { %v1127_v12 = vmax.f32 %v1111_v9, 0.0  ;;  %v3902_v25 = vrot.slane %v1173_v22, %v1172_v59  ;;  %v1914_v37 = vadd.f32 %v2585_v58, %v2584_v42  ;;  %vm1654_vm15 = vcmp.eq.s32.totalorder %v3941_v31, %v3875_v19 }
 0x2bd   :  { %v3910_v27 = vrot.slane %v1177_v20, %v1172_v59  ;;  %vm4367_vm10 = vcmp.eq.s32.totalorder %v3908_v18, %v3875_v19  ;;  %vm4366_vm11 = vcmp.eq.s32.totalorder %v3908_v18, %v3891_v23  ;;  %v2587_v50 = vsel %vm1644_vm2, 1.0, %v3433_v39 }
 0x2be   :  { %v1135_v55 = vpack.c.bf16 %v1127_v12, %v1126_v11  ;;  %1915 = vadd.xlane.f32.xlu1 %v1914_v37  ;;  %v1917_v40 = vadd.f32 %v2587_v50, %v2586_v49  ;;  %v2591_v63 = vsel %vm4365_vm6, 1.0, %v3433_v39  ;;  %v2589_v6 = vsel %vm1646_vm4, 1.0, %v3433_v39 }
 0x2bf   :  { %v1923_v5 = vadd.f32 %v2591_v63, %v2590_v51  ;;  %v2594_v53 = vsel %vm4366_vm11, 1.0, %v3433_v39  ;;  %v2595_v7 = vsel %vm4367_vm10, 1.0, %v3433_v39  ;;  %vm1658_vm7 = vcmp.eq.s32.totalorder %v3945_v34, %v3875_v19 }
 0x2c0   :  { %1428 = vmatmul.mubr.bf16.gmra.mrb[60].mxu0 %v1135_v55  ;;  %2949 = vmatmul.mubr.bf16.gmra.mrb[60].mxu1 %v1135_v55  ;;  %vm4374_vm6 = vcmp.eq.s32.totalorder %v3945_v34, %v3891_v23  ;;  %v1920_v12 = vadd.f32 %v2589_v6, %v2588_v2  ;;  %v1929_v55 = vadd.f32 %v2595_v7, %v2594_v53  ;;  %v2592_v22 = vsel %vm4368_vm9, 1.0, %v3433_v39 }
 0x2c1   :  { %2616 = vmatprep.mubr.msk.f32.mxu0 %vm1642_vm0, %v3432_v15  ;;  %vm4373_vm0 = vcmp.eq.s32.totalorder %v3948_v57, %v3875_v19  ;;  %1918 = vadd.xlane.f32.xlu0 %v1917_v40  ;;  %v2593_v20 = vsel %vm1650_vm8, 1.0, %v3433_v39  ;;  %vm4376_vm11 = vcmp.eq.s32.totalorder %v3966_v44, %v3875_v19  ;;  %vm1662_vm10 = vcmp.eq.s32.totalorder %v3952_v38, %v3875_v19 }
 0x2c2   :  { %1924 = vadd.xlane.f32.xlu1 %v1923_v5  ;;  %vm1661_vm9 = vcmp.eq.s32.totalorder %v3952_v38, %v3891_v23  ;;  %v2598_v37 = vsel %vm4369_vm12, 1.0, %v3433_v39  ;;  %v2599_v50 = vsel %vm4370_vm14, 1.0, %v3433_v39  ;;  %v2596_v51 = vsel %vm4371_vm13, 1.0, %v3433_v39 }
 0x2c3   :  { %v1935_v63 = vadd.f32 %v2599_v50, %v2598_v37  ;;  %v2597_v2 = vsel %vm1654_vm15, 1.0, %v3433_v39  ;;  %vm4375_vm12 = vcmp.eq.s32.totalorder %v3966_v44, %v3891_v23  ;;  %v2602_v3 = vsel %vm4372_vm1, 1.0, %v3433_v39 }
 0x2c4   :  { %v2603_v5 = vsel %vm4373_vm0, 1.0, %v3433_v39  ;;  %vm1666_vm14 = vcmp.eq.s32.totalorder %v3969_v45, %v3875_v19  ;;  %vm1665_vm13 = vcmp.eq.s32.totalorder %v3969_v45, %v3891_v23  ;;  %v1932_v7 = vadd.f32 %v2597_v2, %v2596_v51 }
 0x2c5   :  { %1921 = vadd.xlane.f32.xlu0 %v1920_v12  ;;  %v2601_v12 = vsel %vm1658_vm7, 1.0, %v3433_v39  ;;  %vm1668_vm1 = vcmp.eq.s32.totalorder %v3976_v56, %v3875_v19  ;;  %vm4377_vm0 = vcmp.eq.s32.totalorder %v3976_v56, %v3891_v23 }
 0x2c6   :  { %1930 = vadd.xlane.f32.xlu1 %v1929_v55 }
 0x2ca   :  { %1936 = vadd.xlane.f32.xlu1 %v1935_v63 }
 0x35b   :  { %v1359_v28 = vpop.f32.mrb[32].mxu0 }
 0x35c   :  { %v1360_v29 = vadd.f32 %v1359_v28, %v3902_v25  ;;  %v1361_v30 = vpop.f32.mrb[33].mxu0 }
 0x35d   :  { %v1362_v32 = vadd.f32 %v1361_v30, %v3910_v27  ;;  %v1363_v33 = vpop.f32.mrb[34].mxu0 }
 0x35e   :  { %v1364_v35 = vadd.f32 %v1363_v33, %v3902_v25  ;;  %v1365_v36 = vpop.f32.mrb[35].mxu0  ;;  %v1535_v46 = vmax.f32 %v1360_v29, 0.0 }
 0x35f   :  { %v1536_v43 = vmax.f32 %v1362_v32, 0.0  ;;  %v1366_v41 = vadd.f32 %v1365_v36, %v3910_v27 }
 0x360   :  { %v1538_v47 = vmax.f32 %v1364_v35, 0.0  ;;  %v3185_v35 = vld [vmem:[#allocation12 + $0x10] sm:$0xff]  }
 0x361   :  { %2404 = vst [vmem:[#allocation16] sm:$0xff] %v1536_v43  ;;  %v1539_v48 = vmax.f32 %v1366_v41, 0.0  ;;  %2956 = vmatprep.subr.bf16.mxu1 %v3185_v35 }
 0x362   :  { %v3992_v1 = vpack.c.bf16 %v1538_v47, %v1535_v46  ;;  %v1926_v47 = vadd.f32 %v2593_v20, %v2592_v22  ;;  %2957 = vmatpush3.bf16.msra.mxu1 %v3185_v35  ;;  %v2606_v20 = vsel %vm4375_vm12, 1.0, %v3433_v39 }
 0x363   :  { %2405 = vst [vmem:[#allocation16 + $0x8] sm:$0xff] %v1539_v48  ;;  %v1369_v4 = vpop.f32.mrb[36].mxu0  ;;  %v2938_v60 = vpop.f32.mrb[48].mxu1 }
 0x364   :  { %v1370_v8 = vadd.f32 %v1369_v4, %v3902_v25  ;;  %v1481_v62 = vadd.f32 %v2938_v60, %v3912_v17  ;;  %v1371_v9 = vpop.f32.mrb[37].mxu0  ;;  %v1472_v11 = vpop.f32.mrb[49].mxu1  ;;  %1927 = vadd.xlane.f32.xlu0 %v1926_v47  ;;  %v2609_v47 = vsel %vm1666_vm14, 1.0, %v3433_v39 }
 0x365   :  { %v1372_v59 = vadd.f32 %v1371_v9, %v3910_v27  ;;  %v1473_v16 = vadd.f32 %v1472_v11, %v3912_v17  ;;  %v1373_v0 = vpop.f32.mrb[38].mxu0  ;;  %v2939_v61 = vpop.f32.mrb[50].mxu1  ;;  %v4077_v9 = vadd.s32 112, %v3819_v14  ;;  %v2600_v11 = vsel %vm4374_vm6, 1.0, %v3433_v39 }
 0x366   :  { %v1541_v21 = vmax.f32 %v1370_v8, 0.0  ;;  %v1543_v28 = vmax.f32 %v1481_v62, 0.0  ;;  %v1374_v29 = vadd.f32 %v1373_v0, %v3902_v25  ;;  %v1484_v30 = vadd.f32 %v2939_v61, %v3912_v17  ;;  %v1375_v32 = vpop.f32.mrb[39].mxu0  ;;  %v1475_v33 = vpop.f32.mrb[51].mxu1 }
 0x367   :  { %v1542_v36 = vmax.f32 %v1372_v59, 0.0  ;;  %v1537_v42 = vmax.f32 %v1473_v16, 0.0  ;;  %v1376_v58 = vadd.f32 %v1375_v32, %v3910_v27  ;;  %v1476_v43 = vadd.f32 %v1475_v33, %v3912_v17 }
 0x368   :  { %v1544_v41 = vmax.f32 %v1374_v29, 0.0  ;;  %v1546_v46 = vmax.f32 %v1484_v30, 0.0  ;;  %v4092_v16 = vadd.s32 120, %v3819_v14  ;;  %v1941_v0 = vadd.f32 %v2603_v5, %v2602_v3  ;;  %1933 = vadd.xlane.f32.xlu0 %v1932_v7 }
 0x369   :  { %2406 = vst [vmem:[#allocation16 + $0x10] sm:$0xff] %v1542_v36  ;;  %v1545_v48 = vmax.f32 %v1376_v58, 0.0  ;;  %v1540_v49 = vmax.f32 %v1476_v43, 0.0  ;;  %v1938_v29 = vadd.f32 %v2601_v12, %v2600_v11  ;;  %vm1670_vm6 = vcmp.eq.s32.totalorder %v4077_v9, %v3875_v19 }
 0x36a   :  { %v3054_v13 = vpack.c.bf16 %v1544_v41, %v1541_v21  ;;  %v3052_v40 = vpack.c.bf16 %v1546_v46, %v1543_v28  ;;  %v2604_v32 = vsel %vm1661_vm9, 1.0, %v3433_v39  ;;  %v2605_v33 = vsel %vm1662_vm10, 1.0, %v3433_v39  ;;  %1942 = vadd.xlane.f32.xlu1 %v1941_v0 }
 0x36b   :  { %2407 = vst [vmem:[#allocation16 + $0x18] sm:$0xff] %v1545_v48  ;;  %v3048_v4 = vpack.c.bf16 %v1540_v49, %v1537_v42  ;;  %v1379_v60 = vpop.f32.mrb[40].mxu0  ;;  %v2610_v42 = vsel %vm4377_vm0, 1.0, %v3433_v39  ;;  %v2611_v58 = vsel %vm1668_vm1, 1.0, %v3433_v39  ;;  %vm1669_vm12 = vcmp.eq.s32.totalorder %v4077_v9, %v3891_v23 }
 0x36c   :  { %v1380_v6 = vadd.f32 %v1379_v60, %v3902_v25  ;;  %v1381_v53 = vpop.f32.mrb[41].mxu0  ;;  %v2608_v46 = vsel %vm1665_vm13, 1.0, %v3433_v39  ;;  %vm4378_vm0 = vcmp.eq.s32.totalorder %v4092_v16, %v3891_v23  ;;  %1939 = vadd.xlane.f32.xlu0 %v1938_v29  ;;  %v1944_v51 = vadd.f32 %v2605_v33, %v2604_v32 }
 0x36d   :  { %v1382_v8 = vadd.f32 %v1381_v53, %v3910_v27  ;;  %v1383_v62 = vpop.f32.mrb[42].mxu0  ;;  %3049 = vmatprep.subr.bf16.mxu0 %v3048_v4  ;;  %v1953_v60 = vadd.f32 %v2611_v58, %v2610_v42  ;;  %v2614_v3 = vsel %vm4378_vm0, 1.0, %v3433_v39  ;;  %vm4379_vm0 = vcmp.eq.s32.totalorder %v3819_v14, %v3891_v23 }
 0x36e   :  { %v1384_v55 = vadd.f32 %v1383_v62, %v3902_v25  ;;  %v1385_v59 = vpop.f32.mrb[43].mxu0  ;;  %3051 = vmatpush3.bf16.msra.mxu0 %v3992_v1  ;;  %v2607_v1 = vsel %vm4376_vm11, 1.0, %v3433_v39  ;;  %v1547_v21 = vmax.f32 %v1380_v6, 0.0  ;;  %vm1672_vm11 = vcmp.eq.s32.totalorder %v4092_v16, %v3875_v19 }
 0x36f   :  { %v1548_v61 = vmax.f32 %v1382_v8, 0.0  ;;  %v1386_v22 = vadd.f32 %v1385_v59, %v3910_v27  ;;  %3053 = vmatprep.subr.bf16.mxu0 %v3052_v40  ;;  %v1947_v36 = vadd.f32 %v2607_v1, %v2606_v20  ;;  %v1950_v8 = vadd.f32 %v2609_v47, %v2608_v46  ;;  %v3187_v1 = vld [vmem:[#allocation12 + $0x20] sm:$0xff]  }
 0x370   :  { %v1550_v28 = vmax.f32 %v1384_v55, 0.0  ;;  %v2615_v62 = vsel %vm1672_vm11, 1.0, %v3433_v39  ;;  %v2612_v59 = vsel %vm1669_vm12, 1.0, %v3433_v39  ;;  %1945 = vadd.xlane.f32.xlu0 %v1944_v51 }
 0x371   :  { %2408 = vst [vmem:[#allocation16 + $0x20] sm:$0xff] %v1548_v61  ;;  %v1551_v30 = vmax.f32 %v1386_v22, 0.0  ;;  %1948 = vadd.xlane.f32.xlu1 %v1947_v36  ;;  %v1959_v36 = vadd.f32 %v2615_v62, %v2614_v3 }
 0x372   :  { %v4115_v35 = vpack.c.bf16 %v1550_v28, %v1547_v21  ;;  %3055 = vmatpush3.bf16.msra.mxu0 %v3054_v13  ;;  %v3186_v13 = vld [vmem:[#allocation12 + $0x18] sm:$0xff]  }
 0x373   :  { %2409 = vst [vmem:[#allocation16 + $0x28] sm:$0xff] %v1551_v30  ;;  %v1389_v43 = vpop.f32.mrb[44].mxu0  ;;  %v2942_v41 = vpop.f32.mrb[52].mxu1  ;;  %2958 = vmatprep.subr.bf16.mxu1 %v3186_v13  ;;  %v2613_v30 = vsel %vm1670_vm6, 1.0, %v3433_v39 }
 0x374   :  { %v1390_v37 = vadd.f32 %v1389_v43, %v3902_v25  ;;  %v1497_v48 = vadd.f32 %v2942_v41, %v3912_v17  ;;  %v1391_v49 = vpop.f32.mrb[45].mxu0  ;;  %v1488_v50 = vpop.f32.mrb[53].mxu1  ;;  %2959 = vmatpush3.bf16.msra.mxu1 %v3186_v13  ;;  %1951 = vadd.xlane.f32.xlu0 %v1950_v8  ;;  %v1956_v46 = vadd.f32 %v2613_v30, %v2612_v59 }
 0x375   :  { %v1392_v40 = vadd.f32 %v1391_v49, %v3910_v27  ;;  %v1489_v63 = vadd.f32 %v1488_v50, %v3912_v17  ;;  %v1393_v2 = vpop.f32.mrb[46].mxu0  ;;  %v2943_v4 = vpop.f32.mrb[54].mxu1  ;;  %1954 = vadd.xlane.f32.xlu1 %v1953_v60  ;;  %2960 = vmatprep.subr.bf16.mxu1 %v3187_v1 }
 0x376   :  { %v1394_v5 = vadd.f32 %v1393_v2, %v3902_v25  ;;  %v1500_v6 = vadd.f32 %v2943_v4, %v3912_v17  ;;  %v1395_v53 = vpop.f32.mrb[47].mxu0  ;;  %v1491_v7 = vpop.f32.mrb[55].mxu1  ;;  %v1553_v0 = vmax.f32 %v1390_v37, 0.0  ;;  %v1555_v61 = vmax.f32 %v1497_v48, 0.0 }
 0x377   :  { %v1554_v11 = vmax.f32 %v1392_v40, 0.0  ;;  %v1396_v12 = vadd.f32 %v1395_v53, %v3910_v27  ;;  %v1492_v55 = vadd.f32 %v1491_v7, %v3912_v17  ;;  %v1549_v21 = vmax.f32 %v1489_v63, 0.0 }
 0x378   :  { %v1556_v22 = vmax.f32 %v1394_v5, 0.0  ;;  %v1558_v20 = vmax.f32 %v1500_v6, 0.0  ;;  %2961 = vmatpush3.bf16.msra.mxu1 %v3187_v1  ;;  %1957 = vadd.xlane.f32.xlu0 %v1956_v46 }
 0x379   :  { %2410 = vst [vmem:[#allocation16 + $0x30] sm:$0xff] %v1554_v11  ;;  %v1557_v28 = vmax.f32 %v1396_v12, 0.0  ;;  %v1552_v29 = vmax.f32 %v1492_v55, 0.0  ;;  %1960 = vadd.xlane.f32.xlu1 %v1959_v36  ;;  %2962 = vmatprep.subr.bf16.mxu1 %v3188_v10 }
 0x37a   :  { %v3062_v32 = vpack.c.bf16 %v1556_v22, %v1553_v0  ;;  %v3060_v33 = vpack.c.bf16 %v1558_v20, %v1555_v61 }
 0x37b   :  { %2411 = vst [vmem:[#allocation16 + $0x38] sm:$0xff] %v1557_v28  ;;  %v3056_v42 = vpack.c.bf16 %v1552_v29, %v1549_v21  ;;  %v1399_v58 = vpop.f32.mrb[48].mxu0 }
 0x37c   :  { %v1400_v43 = vadd.f32 %v1399_v58, %v3902_v25  ;;  %v1401_v41 = vpop.f32.mrb[49].mxu0  ;;  %2963 = vmatpush3.bf16.msra.mxu1 %v3188_v10 }
 0x37d   :  { %v1402_v47 = vadd.f32 %v1401_v41, %v3910_v27  ;;  %v1403_v37 = vpop.f32.mrb[50].mxu0  ;;  %3057 = vmatprep.subr.bf16.mxu0 %v3056_v42  ;;  %2964 = vmatprep.subr.bf16.mxu1 %v3189_v52 }
 0x37e   :  { %v1404_v39 = vadd.f32 %v1403_v37, %v3902_v25  ;;  %v1405_v48 = vpop.f32.mrb[51].mxu0  ;;  %3059 = vmatpush3.bf16.msra.mxu0 %v4115_v35  ;;  %v1559_v51 = vmax.f32 %v1400_v43, 0.0 }
 0x37f   :  { %v1560_v49 = vmax.f32 %v1402_v47, 0.0  ;;  %v1406_v50 = vadd.f32 %v1405_v48, %v3910_v27  ;;  %3061 = vmatprep.subr.bf16.mxu0 %v3060_v33 }
 0x380   :  { %v1562_v13 = vmax.f32 %v1404_v39, 0.0  ;;  %2965 = vmatpush3.bf16.msra.mxu1 %v3189_v52 }
 0x381   :  { %2412 = vst [vmem:[#allocation16 + $0x40] sm:$0xff] %v1560_v49  ;;  %v1563_v40 = vmax.f32 %v1406_v50, 0.0 }
 0x382   :  { %v3066_v63 = vpack.c.bf16 %v1562_v13, %v1559_v51  ;;  %3063 = vmatpush3.bf16.msra.mxu0 %v3062_v32 }
 0x383   :  { %2413 = vst [vmem:[#allocation16 + $0x48] sm:$0xff] %v1563_v40  ;;  %v1409_v2 = vpop.f32.mrb[52].mxu0  ;;  %v2946_v4 = vpop.f32.mrb[56].mxu1 }
 0x384   :  { %v1410_v60 = vadd.f32 %v1409_v2, %v3902_v25  ;;  %v1513_v3 = vadd.f32 %v2946_v4, %v3912_v17  ;;  %v1411_v35 = vpop.f32.mrb[53].mxu0  ;;  %v1504_v5 = vpop.f32.mrb[57].mxu1 }
 0x385   :  { %v1412_v6 = vadd.f32 %v1411_v35, %v3910_v27  ;;  %v1505_v53 = vadd.f32 %v1504_v5, %v3912_v17  ;;  %v1413_v7 = vpop.f32.mrb[54].mxu0  ;;  %v2947_v8 = vpop.f32.mrb[58].mxu1 }
 0x386   :  { %v1414_v62 = vadd.f32 %v1413_v7, %v3902_v25  ;;  %v1516_v11 = vadd.f32 %v2947_v8, %v3912_v17  ;;  %v1415_v12 = vpop.f32.mrb[55].mxu0  ;;  %v1507_v55 = vpop.f32.mrb[59].mxu1  ;;  %v1565_v22 = vmax.f32 %v1410_v60, 0.0  ;;  %v1567_v20 = vmax.f32 %v1513_v3, 0.0 }
 0x387   :  { %v1566_v59 = vmax.f32 %v1412_v6, 0.0  ;;  %v1416_v0 = vadd.f32 %v1415_v12, %v3910_v27  ;;  %v1508_v61 = vadd.f32 %v1507_v55, %v3912_v17  ;;  %v1561_v28 = vmax.f32 %v1505_v53, 0.0 }
 0x388   :  { %v1568_v1 = vmax.f32 %v1414_v62, 0.0  ;;  %v1570_v21 = vmax.f32 %v1516_v11, 0.0 }
 0x389   :  { %2414 = vst [vmem:[#allocation16 + $0x50] sm:$0xff] %v1566_v59  ;;  %v1569_v29 = vmax.f32 %v1416_v0, 0.0  ;;  %v1564_v30 = vmax.f32 %v1508_v61, 0.0 }
 0x38a   :  { %v3070_v32 = vpack.c.bf16 %v1568_v1, %v1565_v22  ;;  %v3068_v33 = vpack.c.bf16 %v1570_v21, %v1567_v20 }
 0x38b   :  { %2415 = vst [vmem:[#allocation16 + $0x58] sm:$0xff] %v1569_v29  ;;  %v3064_v36 = vpack.c.bf16 %v1564_v30, %v1561_v28  ;;  %v1419_v42 = vpop.f32.mrb[56].mxu0 }
 0x38c   :  { %v1420_v58 = vadd.f32 %v1419_v42, %v3902_v25  ;;  %v1421_v43 = vpop.f32.mrb[57].mxu0 }
 0x38d   :  { %v1422_v41 = vadd.f32 %v1421_v43, %v3910_v27  ;;  %v1423_v46 = vpop.f32.mrb[58].mxu0  ;;  %3065 = vmatprep.subr.bf16.mxu0 %v3064_v36 }
 0x38e   :  { %v1424_v47 = vadd.f32 %v1423_v46, %v3902_v25  ;;  %v1425_v37 = vpop.f32.mrb[59].mxu0  ;;  %3067 = vmatpush3.bf16.msra.mxu0 %v3066_v63  ;;  %v1571_v49 = vmax.f32 %v1420_v58, 0.0 }
 0x38f   :  { %v1572_v39 = vmax.f32 %v1422_v41, 0.0  ;;  %v1426_v48 = vadd.f32 %v1425_v37, %v3910_v27  ;;  %3069 = vmatprep.subr.bf16.mxu0 %v3068_v33 }
 0x390   :  { %v1574_v50 = vmax.f32 %v1424_v47, 0.0 }
 0x391   :  { %2416 = vst [vmem:[#allocation16 + $0x60] sm:$0xff] %v1572_v39  ;;  %v1575_v51 = vmax.f32 %v1426_v48, 0.0 }
 0x392   :  { %v3074_v13 = vpack.c.bf16 %v1574_v50, %v1571_v49  ;;  %3071 = vmatpush3.bf16.msra.mxu0 %v3070_v32 }
 0x393   :  { %2417 = vst [vmem:[#allocation16 + $0x68] sm:$0xff] %v1575_v51  ;;  %v1429_v40 = vpop.f32.mrb[60].mxu0  ;;  %v2950_v2 = vpop.f32.mrb[60].mxu1 }
 0x394   :  { %v1430_v4 = vadd.f32 %v1429_v40, %v3902_v25  ;;  %v1529_v60 = vadd.f32 %v2950_v2, %v3912_v17  ;;  %v1431_v3 = vpop.f32.mrb[61].mxu0  ;;  %v1520_v35 = vpop.f32.mrb[61].mxu1 }
 0x395   :  { %v1432_v63 = vadd.f32 %v1431_v3, %v3910_v27  ;;  %v1521_v5 = vadd.f32 %v1520_v35, %v3912_v17  ;;  %v1433_v6 = vpop.f32.mrb[62].mxu0  ;;  %v2951_v53 = vpop.f32.mrb[62].mxu1 }
 0x396   :  { %v1434_v7 = vadd.f32 %v1433_v6, %v3902_v25  ;;  %v1532_v8 = vadd.f32 %v2951_v53, %v3912_v17  ;;  %v1435_v62 = vpop.f32.mrb[63].mxu0  ;;  %v1523_v11 = vpop.f32.mrb[63].mxu1  ;;  %v1577_v0 = vmax.f32 %v1430_v4, 0.0  ;;  %v1579_v61 = vmax.f32 %v1529_v60, 0.0  ;;  %v3192_v53 = vld [vmem:[#allocation13 + $0x8] sm:$0xff]  }
 0x397   :  { %v1578_v12 = vmax.f32 %v1432_v63, 0.0  ;;  %v1436_v55 = vadd.f32 %v1435_v62, %v3910_v27  ;;  %v1524_v59 = vadd.f32 %v1523_v11, %v3912_v17  ;;  %v1573_v1 = vmax.f32 %v1521_v5, 0.0  ;;  %v1919_v27 = vpop.xlane.xlu0 %1918 }
 0x398   :  { %v1580_v22 = vmax.f32 %v1434_v7, 0.0  ;;  %v1582_v20 = vmax.f32 %v1532_v8, 0.0  ;;  %v1963_v17 = vmax.f32 %v1919_v27, 1.0 }
 0x399   :  { %2418 = vst [vmem:[#allocation16 + $0x70] sm:$0xff] %v1578_v12  ;;  %v1581_v21 = vmax.f32 %v1436_v55, 0.0  ;;  %v1576_v28 = vmax.f32 %v1524_v59, 0.0 }
 0x39a   :  { %v3078_v29 = vpack.c.bf16 %v1580_v22, %v1577_v0  ;;  %v3076_v30 = vpack.c.bf16 %v1582_v20, %v1579_v61  ;;  %v3193_v61 = vld [vmem:[#allocation13 + $0x10] sm:$0xff]  }
 0x39b   :  { %2419 = vst [vmem:[#allocation16 + $0x78] sm:$0xff] %v1581_v21  ;;  %v3072_v25 = vpack.c.bf16 %v1576_v28, %v1573_v1 }
 0x39d   :  { %3073 = vmatprep.subr.bf16.mxu0 %v3072_v25  ;;  %v3194_v25 = vld [vmem:[#allocation13 + $0x18] sm:$0xff]  }
 0x39e   :  { %3075 = vmatpush3.bf16.msra.mxu0 %v3074_v13 }
 0x39f   :  { %3077 = vmatprep.subr.bf16.mxu0 %v3076_v30 }
 0x3a2   :  { %3079 = vmatpush3.bf16.msra.mxu0 %v3078_v29 }
 0x3a5   :  { %2617 = vmatmul.mubr.msk.f32.vlgmr.msra.gmra.mrb[64].mxu0 %vm4379_vm0, %v3432_v15  ;;  %vm4380_vm0 = vcmp.eq.s32.totalorder %v3900_v24, %v3875_v19 }
 0x3a6   :  { %2618 = vmatprep.mubr.msk.f32.mxu0 %vm1644_vm2, %v3432_v15  ;;  %vm4381_vm2 = vcmp.eq.s32.totalorder %v3900_v24, %v3891_v23  ;;  %v3190_v24 = vld [vmem:[#allocation12 + $0x38] sm:$0xff]  }
 0x3a7   :  { %2966 = vmatprep.subr.bf16.mxu1 %v3190_v24 }
 0x3a8   :  { %2967 = vmatpush3.bf16.msra.mxu1 %v3190_v24 }
 0x3a9   :  { %2619 = vmatmul.mubr.msk.f32.gmra.mrb[66].mxu0 %vm1643_vm3, %v3432_v15  ;;  %vm4382_vm3 = vcmp.eq.s32.totalorder %v3905_v26, %v3891_v23  ;;  %v3191_v26 = vld [vmem:[#allocation13] sm:$0xff]  }
 0x3aa   :  { %2620 = vmatprep.mubr.msk.f32.mxu0 %vm1646_vm4, %v3432_v15  ;;  %vm4383_vm4 = vcmp.eq.s32.totalorder %v3908_v18, %v3875_v19  ;;  %2984 = vmatprep.subr.bf16.mxu1 %v3191_v26 }
 0x3ad   :  { %2621 = vmatmul.mubr.msk.f32.gmra.mrb[68].mxu0 %vm1645_vm5, %v3432_v15  ;;  %vm4384_vm5 = vcmp.eq.s32.totalorder %v3908_v18, %v3891_v23  ;;  %v1916_v18 = vpop.xlane.xlu1 %1915 }
 0x3ae   :  { %2622 = vmatprep.mubr.msk.f32.mxu0 %vm4380_vm0, %v3432_v15  ;;  %vm4386_vm0 = vcmp.eq.s32.totalorder %v3929_v54, %v3875_v19 }
 0x3b1   :  { %2623 = vmatmul.mubr.msk.f32.gmra.mrb[70].mxu0 %vm4381_vm2, %v3432_v15  ;;  %vm4387_vm2 = vcmp.eq.s32.totalorder %v3929_v54, %v3891_v23  ;;  %v1925_v54 = vpop.xlane.xlu1 %1924 }
 0x3b2   :  { %2624 = vmatprep.mubr.msk.f32.mxu0 %vm1650_vm8, %v3432_v15  ;;  %vm4385_vm8 = vcmp.eq.s32.totalorder %v3941_v31, %v3891_v23 }
 0x3b5   :  { %2625 = vmatmul.mubr.msk.f32.gmra.mrb[72].mxu0 %vm4382_vm3, %v3432_v15  ;;  %vm4389_vm3 = vcmp.eq.s32.totalorder %v3948_v57, %v3875_v19  ;;  %v1931_v9 = vpop.xlane.xlu1 %1930 }
 0x3b6   :  { %2626 = vmatprep.mubr.msk.f32.mxu0 %vm4383_vm4, %v3432_v15  ;;  %vm4390_vm4 = vcmp.eq.s32.totalorder %v3948_v57, %v3891_v23  ;;  %v1967_v42 = vmax.f32 %v1931_v9, 1.0 }
 0x3b9   :  { %2627 = vmatmul.mubr.msk.f32.gmra.mrb[74].mxu0 %vm4384_vm5, %v3432_v15  ;;  %vm4392_vm5 = vcmp.eq.s32.totalorder %v3966_v44, %v3891_v23  ;;  %v1937_v50 = vpop.xlane.xlu1 %1936 }
 0x3ba   :  { %2628 = vmatprep.mubr.msk.f32.mxu0 %vm1654_vm15, %v3432_v15  ;;  %vm4388_vm15 = vcmp.eq.s32.totalorder %v3945_v34, %v3891_v23  ;;  %v1969_v4 = vmax.f32 %v1937_v50, 1.0 }
 0x3bd   :  { %2629 = vmatmul.mubr.msk.f32.gmra.mrb[76].mxu0 %vm4385_vm8, %v3432_v15 }
 0x3be   :  { %2630 = vmatprep.mubr.msk.f32.mxu0 %vm4386_vm0, %v3432_v15 }
 0x3c1   :  { %2631 = vmatmul.mubr.msk.f32.gmra.mrb[78].mxu0 %vm4387_vm2, %v3432_v15 }
 0x3c2   :  { %2632 = vmatprep.mubr.msk.f32.mxu0 %vm1658_vm7, %v3432_v15  ;;  %vm4391_vm7 = vcmp.eq.s32.totalorder %v3966_v44, %v3875_v19  ;;  %v1962_v19 = vmax.f32 %v1916_v18, 1.0 }
 0x3c4   :  { %3199 = vrcp.f32 %v1962_v19 }
 0x3c5   :  { %2633 = vmatmul.mubr.msk.f32.gmra.mrb[80].mxu0 %vm4388_vm15, %v3432_v15  ;;  %3201 = vrcp.f32 %v1963_v17 }
 0x3c6   :  { %2634 = vmatprep.mubr.msk.f32.mxu0 %vm4389_vm3, %v3432_v15 }
 0x3c9   :  { %2635 = vmatmul.mubr.msk.f32.gmra.mrb[82].mxu0 %vm4390_vm4, %v3432_v15 }
 0x3ca   :  { %2636 = vmatprep.mubr.msk.f32.mxu0 %vm1662_vm10, %v3432_v15 }
 0x3cd   :  { %2637 = vmatmul.mubr.msk.f32.gmra.mrb[84].mxu0 %vm1661_vm9, %v3432_v15  ;;  %vm4393_vm9 = vcmp.eq.s32.totalorder %v3976_v56, %v3891_v23 }
 0x3ce   :  { %2638 = vmatprep.mubr.msk.f32.mxu0 %vm4391_vm7, %v3432_v15  ;;  %v3200_v45 = vpop.eup %3199 }
 0x3d1   :  { %2639 = vmatmul.mubr.msk.f32.gmra.mrb[86].mxu0 %vm4392_vm5, %v3432_v15 }
 0x3d2   :  { %2640 = vmatprep.mubr.msk.f32.mxu0 %vm1666_vm14, %v3432_v15 }
 0x3d5   :  { %2641 = vmatmul.mubr.msk.f32.gmra.mrb[88].mxu0 %vm1665_vm13, %v3432_v15 }
 0x3d6   :  { %2642 = vmatprep.mubr.msk.f32.mxu0 %vm1668_vm1, %v3432_v15  ;;  %vm4394_vm1 = vcmp.eq.s32.totalorder %v4092_v16, %v3891_v23  ;;  %v1922_v23 = vpop.xlane.xlu0 %1921  ;;  %v3202_v16 = vpop.eup %3201 }
 0x3d7   :  { %v1964_v31 = vmax.f32 %v1922_v23, 1.0 }
 0x3d9   :  { %2643 = vmatmul.mubr.msk.f32.gmra.mrb[90].mxu0 %vm4393_vm9, %v3432_v15 }
 0x3da   :  { %2644 = vmatprep.mubr.msk.f32.mxu0 %vm1670_vm6, %v3432_v15 }
 0x3dd   :  { %2645 = vmatmul.mubr.msk.f32.gmra.mrb[92].mxu0 %vm1669_vm12, %v3432_v15 }
 0x3de   :  { %2646 = vmatprep.mubr.msk.f32.mxu0 %vm1672_vm11, %v3432_v15 }
 0x3e1   :  { %2647 = vmatmul.mubr.msk.f32.gmra.mrb[94].mxu0 %vm4394_vm1, %v3432_v15  ;;  %v1965_v15 = vmax.f32 %v1925_v54, 1.0  ;;  %v3195_v54 = vld [vmem:[#allocation13 + $0x20] sm:$0xff]  }
 0x3e3   :  { %3203 = vrcp.f32 %v1965_v15 }
 0x3e4   :  { %3205 = vrcp.f32 %v1964_v31 }
 0x3ed   :  { %v3204_v48 = vpop.eup %3203 }
 0x3ee   :  { %v3206_v51 = vpop.eup %3205 }
 0x3f1   :  { %v1928_v44 = vpop.xlane.xlu0 %1927 }
 0x3f2   :  { %v1966_v36 = vmax.f32 %v1928_v44, 1.0 }
 0x3f4   :  { %3207 = vrcp.f32 %v1966_v36 }
 0x3f5   :  { %3209 = vrcp.f32 %v1967_v42  ;;  %v1934_v39 = vpop.xlane.xlu0 %1933 }
 0x3f6   :  { %v1968_v2 = vmax.f32 %v1934_v39, 1.0 }
 0x3f7   :  { %v1943_v11 = vpop.xlane.xlu1 %1942 }
 0x3f8   :  { %3211 = vrcp.f32 %v1968_v2  ;;  %v1971_v22 = vmax.f32 %v1943_v11, 1.0 }
 0x3f9   :  { %3213 = vrcp.f32 %v1969_v4  ;;  %v1940_v7 = vpop.xlane.xlu0 %1939 }
 0x3fa   :  { %v1970_v0 = vmax.f32 %v1940_v7, 1.0 }
 0x3fc   :  { %3215 = vrcp.f32 %v1970_v0 }
 0x3fd   :  { %3217 = vrcp.f32 %v1971_v22  ;;  %v1946_v10 = vpop.xlane.xlu0 %1945 }
 0x3fe   :  { %v3208_v8 = vpop.eup %3207  ;;  %v1972_v17 = vmax.f32 %v1946_v10, 1.0 }
 0x3ff   :  { %v3210_v12 = vpop.eup %3209 }
 0x400   :  { %3219 = vrcp.f32 %v1972_v17 }
 0x402   :  { %v3212_v52 = vpop.eup %3211 }
 0x403   :  { %v3214_v18 = vpop.eup %3213 }
 0x406   :  { %v3216_v9 = vpop.eup %3215 }
 0x478   :  { %v2808_v34 = vpop.f32.mrb[64].mxu0 }
 0x479   :  { %v2809_v57 = vpop.f32.mrb[65].mxu0 }
 0x47a   :  { %v2810_v38 = vadd.f32 %v2809_v57, %v2808_v34 }
 0x47c   :  { %v2811_v56 = vpop.f32.mrb[66].mxu0  ;;  %v1994_v58 = vmul.f32 %v3200_v45, %v2810_v38  ;;  %v3196_v45 = vld [vmem:[#allocation13 + $0x28] sm:$0xff]  }
 0x47d   :  { %v2812_v32 = vpop.f32.mrb[67].mxu0 }
 0x47e   :  { %v2813_v33 = vadd.f32 %v2812_v32, %v2811_v56  ;;  %v1952_v56 = vpop.xlane.xlu0 %1951 }
 0x480   :  { %v1995_v43 = vmul.f32 %v3202_v16, %v2813_v33  ;;  %v2814_v41 = vpop.f32.mrb[68].mxu0  ;;  %v3218_v33 = vpop.eup %3217 }
 0x481   :  { %v2815_v46 = vpop.f32.mrb[69].mxu0  ;;  %v3220_v50 = vpop.eup %3219 }
 0x482   :  { %v2816_v47 = vadd.f32 %v2815_v46, %v2814_v41  ;;  %v2010_v37 = vpack.c.bf16 %v1995_v43, %v1994_v58  ;;  %v1974_v58 = vmax.f32 %v1952_v56, 1.0 }
 0x484   :  { %v2817_v49 = vpop.f32.mrb[70].mxu0  ;;  %2968 = vmatprep.mubr.bf16.mxu1 %v2010_v37  ;;  %v1996_v60 = vmul.f32 %v3206_v51, %v2816_v47 }
 0x485   :  { %v2818_v13 = vpop.f32.mrb[71].mxu0 }
 0x486   :  { %v2819_v40 = vadd.f32 %v2818_v13, %v2817_v49  ;;  %v1958_v49 = vpop.xlane.xlu0 %1957 }
 0x488   :  { %v1997_v3 = vmul.f32 %v3204_v48, %v2819_v40  ;;  %v2820_v35 = vpop.f32.mrb[72].mxu0 }
 0x489   :  { %v2821_v63 = vpop.f32.mrb[73].mxu0 }
 0x48a   :  { %v2011_v5 = vpack.c.bf16 %v1997_v3, %v1996_v60  ;;  %v2822_v6 = vadd.f32 %v2821_v63, %v2820_v35  ;;  %v1976_v60 = vmax.f32 %v1958_v49, 1.0 }
 0x48c   :  { %2969 = vmatmul.mubr.bf16.vlgmr.msra.gmra.mrb[64].mxu1 %v2011_v5  ;;  %v2823_v62 = vpop.f32.mrb[74].mxu0  ;;  %v1998_v20 = vmul.f32 %v3208_v8, %v2822_v6 }
 0x48d   :  { %v2824_v55 = vpop.f32.mrb[75].mxu0  ;;  %2985 = vmatpush3.bf16.msra.mxu1 %v3191_v26  ;;  %v1949_v26 = vpop.xlane.xlu1 %1948 }
 0x48e   :  { %v2825_v59 = vadd.f32 %v2824_v55, %v2823_v62  ;;  %2986 = vmatprep.subr.bf16.mxu1 %v3192_v53  ;;  %v1973_v23 = vmax.f32 %v1949_v26, 1.0  ;;  %v3197_v26 = vld [vmem:[#allocation13 + $0x30] sm:$0xff]  }
 0x490   :  { %v1999_v1 = vmul.f32 %v3210_v12, %v2825_v59  ;;  %v2826_v21 = vpop.f32.mrb[76].mxu0  ;;  %3221 = vrcp.f32 %v1973_v23 }
 0x491   :  { %v2827_v28 = vpop.f32.mrb[77].mxu0  ;;  %2987 = vmatpush3.bf16.msra.mxu1 %v3192_v53  ;;  %v1955_v32 = vpop.xlane.xlu1 %1954  ;;  %3223 = vrcp.f32 %v1974_v58 }
 0x492   :  { %v2828_v29 = vadd.f32 %v2827_v28, %v2826_v21  ;;  %v2012_v30 = vpack.c.bf16 %v1999_v1, %v1998_v20  ;;  %2988 = vmatprep.subr.bf16.mxu1 %v3193_v61  ;;  %v1975_v43 = vmax.f32 %v1955_v32, 1.0 }
 0x494   :  { %v2829_v24 = vpop.f32.mrb[78].mxu0  ;;  %2972 = vmatprep.mubr.bf16.mxu1 %v2012_v30  ;;  %v2000_v15 = vmul.f32 %v3212_v52, %v2828_v29  ;;  %3225 = vrcp.f32 %v1975_v43 }
 0x495   :  { %v2830_v27 = vpop.f32.mrb[79].mxu0  ;;  %2989 = vmatpush3.bf16.msra.mxu1 %v3193_v61  ;;  %v1961_v13 = vpop.xlane.xlu1 %1960  ;;  %3227 = vrcp.f32 %v1976_v60 }
 0x496   :  { %v2831_v19 = vadd.f32 %v2830_v27, %v2829_v24  ;;  %2990 = vmatprep.subr.bf16.mxu1 %v3194_v25  ;;  %v1977_v3 = vmax.f32 %v1961_v13, 1.0  ;;  %v2036_v27 = vsub.s32 2, %v3819_v14 }
 0x498   :  { %v2001_v31 = vmul.f32 %v3214_v18, %v2831_v19  ;;  %v2832_v34 = vpop.f32.mrb[80].mxu0  ;;  %3229 = vrcp.f32 %v1977_v3  ;;  %v3198_v18 = vld [vmem:[#allocation13 + $0x38] sm:$0xff]   ;;  %v4316_v19 = vld [vmem:[%s4360_s9] sm:$0xff]  ;;  %s3434_s9 = smov [#allocation16]  }
 0x499   :  { %v2833_v57 = vpop.f32.mrb[81].mxu0  ;;  %2991 = vmatpush3.bf16.msra.mxu1 %v3194_v25  ;;  %v2037_v17 = vrot.slane %v4316_v19, %v2036_v27  ;;  %s2437_s28 = sshll.u32 %s3434_s9, 4  ;;  %s2438_s28 = int_to_ptr.vmem [resolvable:$true] %s2437_s28 }
 0x49a   :  { %v2013_v38 = vpack.c.bf16 %v2001_v31, %v2000_v15  ;;  %v2834_v44 = vadd.f32 %v2833_v57, %v2832_v34  ;;  %2992 = vmatprep.subr.bf16.mxu1 %v3195_v54  ;;  %v3222_v40 = vpop.eup %3221  ;;  %s3364_s13 = scalar_lea.vmem %s2438_s28, 2048  ;;  %p3369_p7 = scmp.lt.s32.totalorder %s2438_s28, %s2438_s28 }
 0x49b   :  { %v3224_v8 = vpop.eup %3223  ;;  %p3365_p6 = scmp.ne.s32.totalorder %s2438_s28, %s3364_s13  ;;  %p3370_p8 = scmp.lt.s32.totalorder %s3364_s13, %s3364_s13 }
 0x49c   :  { %2973 = vmatmul.mubr.bf16.gmra.mrb[68].mxu1 %v2013_v38  ;;  %v2835_v16 = vpop.f32.mrb[82].mxu0  ;;  %v2002_v41 = vmul.f32 %v3216_v9, %v2834_v44 }
 0x49d   :  { %v2836_v36 = vpop.f32.mrb[83].mxu0  ;;  %2993 = vmatpush3.bf16.msra.mxu1 %v3195_v54  ;;  %p3371_p9 = por %p3370_p8, %p3369_p7 }
 0x49e   :  { %v2837_v42 = vadd.f32 %v2836_v36, %v2835_v16  ;;  %2994 = vmatprep.subr.bf16.mxu1 %v3196_v45  ;;  %v3226_v11 = vpop.eup %3225 }
 0x49f   :  { %v3228_v21 = vpop.eup %3227  ;;  %p3372_p10 = pnand %p3371_p9, %p3365_p6 }
 0x4a0   :  { %v2003_v46 = vmul.f32 %v3218_v33, %v2837_v42  ;;  %v2838_v47 = vpop.f32.mrb[84].mxu0 }
 0x4a1   :  { %v2839_v37 = vpop.f32.mrb[85].mxu0  ;;  %2995 = vmatpush3.bf16.msra.mxu1 %v3196_v45 }
 0x4a2   :  { %v2840_v39 = vadd.f32 %v2839_v37, %v2838_v47  ;;  %v2014_v48 = vpack.c.bf16 %v2003_v46, %v2002_v41  ;;  %v3230_v29 = vpop.eup %3229  ;;  %2996 = vmatprep.subr.bf16.mxu1 %v3197_v26 }
 0x4a4   :  { %v2841_v51 = vpop.f32.mrb[86].mxu0  ;;  %2976 = vmatprep.mubr.bf16.mxu1 %v2014_v48  ;;  %v2004_v35 = vmul.f32 %v3220_v50, %v2840_v39 }
 0x4a5   :  { %v2842_v2 = vpop.f32.mrb[87].mxu0  ;;  %2997 = vmatpush3.bf16.msra.mxu1 %v3197_v26 }
 0x4a6   :  { %v2843_v4 = vadd.f32 %v2842_v2, %v2841_v51  ;;  %2998 = vmatprep.subr.bf16.mxu1 %v3198_v18 }
 0x4a8   :  { %v2005_v63 = vmul.f32 %v3222_v40, %v2843_v4  ;;  %v2844_v5 = vpop.f32.mrb[88].mxu0 }
 0x4a9   :  { %v2845_v6 = vpop.f32.mrb[89].mxu0  ;;  %2999 = vmatpush3.bf16.msra.mxu1 %v3198_v18 }
 0x4aa   :  { %v2015_v53 = vpack.c.bf16 %v2005_v63, %v2004_v35  ;;  %v2846_v7 = vadd.f32 %v2845_v6, %v2844_v5 }
 0x4ac   :  { %2977 = vmatmul.mubr.bf16.gmra.mrb[72].mxu1 %v2015_v53  ;;  %v2847_v62 = vpop.f32.mrb[90].mxu0  ;;  %v2006_v59 = vmul.f32 %v3224_v8, %v2846_v7 }
 0x4ad   :  { %v2848_v12 = vpop.f32.mrb[91].mxu0 }
 0x4ae   :  { %v2849_v55 = vadd.f32 %v2848_v12, %v2847_v62 }
 0x4b0   :  { %v2007_v0 = vmul.f32 %v3226_v11, %v2849_v55  ;;  %v2850_v61 = vpop.f32.mrb[92].mxu0 }
 0x4b1   :  { %v2851_v22 = vpop.f32.mrb[93].mxu0 }
 0x4b2   :  { %v2852_v20 = vadd.f32 %v2851_v22, %v2850_v61  ;;  %v2016_v1 = vpack.c.bf16 %v2007_v0, %v2006_v59 }
 0x4b4   :  { %v2853_v28 = vpop.f32.mrb[94].mxu0  ;;  %2980 = vmatprep.mubr.bf16.mxu1 %v2016_v1  ;;  %v2008_v10 = vmul.f32 %v3228_v21, %v2852_v20 }
 0x4b5   :  { %v2854_v30 = vpop.f32.mrb[95].mxu0 }
 0x4b6   :  { %v2855_v25 = vadd.f32 %v2854_v30, %v2853_v28 }
 0x4b8   :  { %v2009_v52 = vmul.f32 %v3230_v29, %v2855_v25 }
 0x4ba   :  { %v2017_v24 = vpack.c.bf16 %v2009_v52, %v2008_v10 }
 0x4bc   :  { %2981 = vmatmul.mubr.bf16.gmra.mrb[76].mxu1 %v2017_v24 }
 0x55f   :  { %v2970_v54 = vpop.f32.mrb[64].mxu1 }
 0x560   :  { %v2129_v23 = vadd.f32 %v2970_v54, %v2037_v17  ;;  %v2120_v15 = vpop.f32.mrb[65].mxu1 }
 0x561   :  { %v2121_v31 = vadd.f32 %v2120_v15, %v2037_v17  ;;  %v2971_v34 = vpop.f32.mrb[66].mxu1 }
 0x562   :  { %v2132_v57 = vadd.f32 %v2971_v34, %v2037_v17  ;;  %v2123_v38 = vpop.f32.mrb[67].mxu1  ;;  %v2185_v45 = vmax.f32 %v2129_v23, 0.0 }
 0x563   :  { %v2124_v44 = vadd.f32 %v2123_v38, %v2037_v17  ;;  %v2183_v9 = vmax.f32 %v2121_v31, 0.0 }
 0x564   :  { %v2186_v56 = vmax.f32 %v2132_v57, 0.0 }
 0x565   :  { %v2184_v16 = vmax.f32 %v2124_v44, 0.0 }
 0x566   :  { %v2200_v32 = vpack.c.bf16 %v2186_v56, %v2185_v45 }
 0x567   :  { %v2199_v33 = vpack.c.bf16 %v2184_v16, %v2183_v9 }
 0x569   :  { %3000 = vmatprep.mubr.bf16.mxu1 %v2199_v33 }
 0x56a   :  { %3001 = vmatmul.mubr.bf16.vlgmr.msra.gmra.mrb[80].mxu1 %v2200_v32 }
 0x56f   :  { %v2974_v36 = vpop.f32.mrb[68].mxu1 }
 0x570   :  { %v2145_v42 = vadd.f32 %v2974_v36, %v2037_v17  ;;  %v2136_v58 = vpop.f32.mrb[69].mxu1 }
 0x571   :  { %v2137_v43 = vadd.f32 %v2136_v58, %v2037_v17  ;;  %v2975_v41 = vpop.f32.mrb[70].mxu1 }
 0x572   :  { %v2148_v46 = vadd.f32 %v2975_v41, %v2037_v17  ;;  %v2139_v47 = vpop.f32.mrb[71].mxu1  ;;  %v2189_v39 = vmax.f32 %v2145_v42, 0.0 }
 0x573   :  { %v2140_v37 = vadd.f32 %v2139_v47, %v2037_v17  ;;  %v2187_v49 = vmax.f32 %v2137_v43, 0.0 }
 0x574   :  { %v2190_v48 = vmax.f32 %v2148_v46, 0.0 }
 0x575   :  { %v2188_v50 = vmax.f32 %v2140_v37, 0.0 }
 0x576   :  { %v2202_v51 = vpack.c.bf16 %v2190_v48, %v2189_v39 }
 0x577   :  { %v2201_v13 = vpack.c.bf16 %v2188_v50, %v2187_v49 }
 0x579   :  { %3004 = vmatprep.mubr.bf16.mxu1 %v2201_v13 }
 0x57a   :  { %3005 = vmatmul.mubr.bf16.gmra.mrb[84].mxu1 %v2202_v51 }
 0x57f   :  { %v2978_v40 = vpop.f32.mrb[72].mxu1 }
 0x580   :  { %v2161_v2 = vadd.f32 %v2978_v40, %v2037_v17  ;;  %v2152_v4 = vpop.f32.mrb[73].mxu1 }
 0x581   :  { %v2153_v60 = vadd.f32 %v2152_v4, %v2037_v17  ;;  %v2979_v3 = vpop.f32.mrb[74].mxu1 }
 0x582   :  { %v2164_v35 = vadd.f32 %v2979_v3, %v2037_v17  ;;  %v2155_v63 = vpop.f32.mrb[75].mxu1  ;;  %v2193_v6 = vmax.f32 %v2161_v2, 0.0 }
 0x583   :  { %v2156_v5 = vadd.f32 %v2155_v63, %v2037_v17  ;;  %v2191_v7 = vmax.f32 %v2153_v60, 0.0 }
 0x584   :  { %v2194_v53 = vmax.f32 %v2164_v35, 0.0 }
 0x585   :  { %v2192_v8 = vmax.f32 %v2156_v5, 0.0 }
 0x586   :  { %v2204_v62 = vpack.c.bf16 %v2194_v53, %v2193_v6 }
 0x587   :  { %v2203_v11 = vpack.c.bf16 %v2192_v8, %v2191_v7 }
 0x589   :  { %3008 = vmatprep.mubr.bf16.mxu1 %v2203_v11 }
 0x58a   :  { %3009 = vmatmul.mubr.bf16.gmra.mrb[88].mxu1 %v2204_v62 }
 0x58f   :  { %v2982_v12 = vpop.f32.mrb[76].mxu1 }
 0x590   :  { %v2177_v55 = vadd.f32 %v2982_v12, %v2037_v17  ;;  %v2168_v59 = vpop.f32.mrb[77].mxu1 }
 0x591   :  { %v2169_v0 = vadd.f32 %v2168_v59, %v2037_v17  ;;  %v2983_v61 = vpop.f32.mrb[78].mxu1 }
 0x592   :  { %v2180_v22 = vadd.f32 %v2983_v61, %v2037_v17  ;;  %v2171_v20 = vpop.f32.mrb[79].mxu1  ;;  %v2197_v21 = vmax.f32 %v2177_v55, 0.0 }
 0x593   :  { %v2172_v1 = vadd.f32 %v2171_v20, %v2037_v17  ;;  %v2195_v29 = vmax.f32 %v2169_v0, 0.0 }
 0x594   :  { %v2198_v28 = vmax.f32 %v2180_v22, 0.0 }
 0x595   :  { %v2196_v30 = vmax.f32 %v2172_v1, 0.0 }
 0x596   :  { %v2206_v25 = vpack.c.bf16 %v2198_v28, %v2197_v21 }
 0x597   :  { %v2205_v10 = vpack.c.bf16 %v2196_v30, %v2195_v29 }
 0x599   :  { %3012 = vmatprep.mubr.bf16.mxu1 %v2205_v10 }
 0x59a   :  { %3013 = vmatmul.mubr.bf16.gmra.mrb[92].mxu1 %v2206_v25 }
 0x59b   :  { %3375 = shalt.err (!%p3372_p10)
}
 0x59c   :  { %s3376_s14 = scalar_lea.hbm %s4362_s11, 2048 }
 0x59d   :  { %p3377_p11 = scmp.ne.s32.totalorder %s4362_s11, %s3376_s14  ;;  %p3380_p12 = scmp.lt.u32.totalorder %s3376_s14, %s4362_s11 }
 0x59f   :  { %p3382_p13 = pnand %p3380_p12, %p3377_p11 }
 0x5a1   :  { %3385 = shalt.err (!%p3382_p13)
}
 0x5a2   :  { %s3435_s8 = smov 128   ;;  %s3436_s29 = smov 8   ;;  %v2225_v52 = vsub.s32 3, %v3819_v14 }
 0x5a3   :  { %2443 = dma.vmem_to_hbm [thread:$0]  %s2438_s28, 2048, %s4362_s11, [#allocation17], %s3435_s8, %s3435_s8, %s3436_s29  }
 0x5a4   :  { %v2226_v24 = vrot.slane %v4316_v19, %v2225_v52  ;;  %s3437_s11 = smov [#allocation15]  }
 0x5a5   :  { %s2425_s21 = sshll.u32 %s3437_s11, 4  ;;  %s2426_s21 = int_to_ptr.vmem [resolvable:$true] %s2425_s21 }
 0x5a6   :  { %s3386_s6 = scalar_lea.vmem %s2426_s21, 2048  ;;  %p3391_p1 = scmp.lt.s32.totalorder %s2426_s21, %s2426_s21 }
 0x5a7   :  { %p3387_p0 = scmp.ne.s32.totalorder %s2426_s21, %s3386_s6  ;;  %p3392_p2 = scmp.lt.s32.totalorder %s3386_s6, %s3386_s6 }
 0x5a9   :  { %p3393_p3 = por %p3392_p2, %p3391_p1 }
 0x5ab   :  { %p3394_p4 = pnand %p3393_p3, %p3387_p0 }
 0x63d   :  { %v3002_v26 = vpop.f32.mrb[80].mxu1 }
 0x63e   :  { %v2318_v18 = vadd.f32 %v3002_v26, %v2226_v24  ;;  %v2309_v27 = vpop.f32.mrb[81].mxu1 }
 0x63f   :  { %v2310_v17 = vadd.f32 %v2309_v27, %v2226_v24  ;;  %v3003_v54 = vpop.f32.mrb[82].mxu1 }
 0x640   :  { %v2374_v23 = vmax.f32 %v2318_v18, 0.0  ;;  %v2321_v15 = vadd.f32 %v3003_v54, %v2226_v24  ;;  %v2312_v31 = vpop.f32.mrb[83].mxu1 }
 0x641   :  { %v2372_v34 = vmax.f32 %v2310_v17, 0.0  ;;  %v2313_v57 = vadd.f32 %v2312_v31, %v2226_v24 }
 0x642   :  { %2390 = vst [vmem:[#allocation15 + $0x10] sm:$0xff] %v2374_v23  ;;  %v2375_v38 = vmax.f32 %v2321_v15, 0.0 }
 0x643   :  { %2388 = vst [vmem:[#allocation15] sm:$0xff] %v2372_v34  ;;  %v2373_v44 = vmax.f32 %v2313_v57, 0.0 }
 0x644   :  { %2391 = vst [vmem:[#allocation15 + $0x18] sm:$0xff] %v2375_v38 }
 0x645   :  { %2389 = vst [vmem:[#allocation15 + $0x8] sm:$0xff] %v2373_v44 }
 0x64d   :  { %v3006_v45 = vpop.f32.mrb[84].mxu1 }
 0x64e   :  { %v2334_v14 = vadd.f32 %v3006_v45, %v2226_v24  ;;  %v2325_v56 = vpop.f32.mrb[85].mxu1 }
 0x64f   :  { %v2326_v19 = vadd.f32 %v2325_v56, %v2226_v24  ;;  %v3007_v9 = vpop.f32.mrb[86].mxu1 }
 0x650   :  { %v2378_v16 = vmax.f32 %v2334_v14, 0.0  ;;  %v2337_v32 = vadd.f32 %v3007_v9, %v2226_v24  ;;  %v2328_v33 = vpop.f32.mrb[87].mxu1 }
 0x651   :  { %v2376_v36 = vmax.f32 %v2326_v19, 0.0  ;;  %v2329_v42 = vadd.f32 %v2328_v33, %v2226_v24 }
 0x652   :  { %2394 = vst [vmem:[#allocation15 + $0x30] sm:$0xff] %v2378_v16  ;;  %v2379_v58 = vmax.f32 %v2337_v32, 0.0 }
 0x653   :  { %2392 = vst [vmem:[#allocation15 + $0x20] sm:$0xff] %v2376_v36  ;;  %v2377_v43 = vmax.f32 %v2329_v42, 0.0 }
 0x654   :  { %2395 = vst [vmem:[#allocation15 + $0x38] sm:$0xff] %v2379_v58 }
 0x655   :  { %2393 = vst [vmem:[#allocation15 + $0x28] sm:$0xff] %v2377_v43 }
 0x65d   :  { %v3010_v41 = vpop.f32.mrb[88].mxu1 }
 0x65e   :  { %v2350_v46 = vadd.f32 %v3010_v41, %v2226_v24  ;;  %v2341_v47 = vpop.f32.mrb[89].mxu1 }
 0x65f   :  { %v2342_v37 = vadd.f32 %v2341_v47, %v2226_v24  ;;  %v3011_v39 = vpop.f32.mrb[90].mxu1 }
 0x660   :  { %v2382_v48 = vmax.f32 %v2350_v46, 0.0  ;;  %v2353_v49 = vadd.f32 %v3011_v39, %v2226_v24  ;;  %v2344_v50 = vpop.f32.mrb[91].mxu1 }
 0x661   :  { %v2380_v51 = vmax.f32 %v2342_v37, 0.0  ;;  %v2345_v13 = vadd.f32 %v2344_v50, %v2226_v24 }
 0x662   :  { %2398 = vst [vmem:[#allocation15 + $0x50] sm:$0xff] %v2382_v48  ;;  %v2383_v40 = vmax.f32 %v2353_v49, 0.0 }
 0x663   :  { %2396 = vst [vmem:[#allocation15 + $0x40] sm:$0xff] %v2380_v51  ;;  %v2381_v2 = vmax.f32 %v2345_v13, 0.0 }
 0x664   :  { %2399 = vst [vmem:[#allocation15 + $0x58] sm:$0xff] %v2383_v40 }
 0x665   :  { %2397 = vst [vmem:[#allocation15 + $0x48] sm:$0xff] %v2381_v2 }
 0x66d   :  { %v3014_v4 = vpop.f32.mrb[92].mxu1 }
 0x66e   :  { %v2366_v60 = vadd.f32 %v3014_v4, %v2226_v24  ;;  %v2357_v3 = vpop.f32.mrb[93].mxu1 }
 0x66f   :  { %v2358_v35 = vadd.f32 %v2357_v3, %v2226_v24  ;;  %v3015_v63 = vpop.f32.mrb[94].mxu1 }
 0x670   :  { %v2386_v5 = vmax.f32 %v2366_v60, 0.0  ;;  %v2369_v6 = vadd.f32 %v3015_v63, %v2226_v24  ;;  %v2360_v53 = vpop.f32.mrb[95].mxu1 }
 0x671   :  { %v2384_v7 = vmax.f32 %v2358_v35, 0.0  ;;  %v2361_v8 = vadd.f32 %v2360_v53, %v2226_v24 }
 0x672   :  { %2402 = vst [vmem:[#allocation15 + $0x70] sm:$0xff] %v2386_v5  ;;  %v2387_v62 = vmax.f32 %v2369_v6, 0.0 }
 0x673   :  { %2400 = vst [vmem:[#allocation15 + $0x60] sm:$0xff] %v2384_v7  ;;  %v2385_v11 = vmax.f32 %v2361_v8, 0.0 }
 0x674   :  { %2403 = vst [vmem:[#allocation15 + $0x78] sm:$0xff] %v2387_v62 }
 0x675   :  { %2401 = vst [vmem:[#allocation15 + $0x68] sm:$0xff] %v2385_v11 }
 0x676   :  { %3397 = shalt.err (!%p3394_p4)
}
 0x677   :  { %s3398_s23 = scalar_lea.hbm %s4361_s10, 2048 }
 0x678   :  { %p3399_p5 = scmp.ne.s32.totalorder %s4361_s10, %s3398_s23  ;;  %p3402_p6 = scmp.lt.u32.totalorder %s3398_s23, %s4361_s10 }
 0x67a   :  { %p3404_p7 = pnand %p3402_p6, %p3399_p5 }
 0x67c   :  { %3407 = shalt.err (!%p3404_p7)
}
 0x67d   :  { %2431 = dma.vmem_to_hbm [thread:$0]  %s2426_s21, 2048, %s4361_s10, [#allocation6], %s3435_s8, %s3435_s8, %s3436_s29  }
 0x67e   :  { %3416 = dma.done.wait [#allocation6], 2048  }
 0x67f   :  { %3417 = vsyncadd [#allocation6], 4294965248 }
 0x680   :  { %3418 = dma.done.wait [#allocation17], 2048  }
 0x681   :  { %3419 = vsyncadd [#allocation17], 4294965248 }
 0x682   :  { %2450 = vsyncpa [#allocation5], 1 }
 0x683   :  { %2451 = vsyncpa [#allocation8], 1 }
 0x684   :  { %2452 = vsyncpa [#allocation11], 1 }
 0x685   :  { %2453 = vsyncpa [#allocation14], 1 }
 0x686   :  { %2454 = vsyncpa [#allocation6], 1 }
 0x687   :  { %2455 = vsyncpa [#allocation17], 1 }

</bundles_post_ra>
